<compile_context>
chip_gen: v7x
topology: tpu7x:2x2x1
jax: 0.10.0
libtpu: 0.0.40
codegen_flags: <defaults>
</compile_context>

<pallas_src>
import jax
import jax.numpy as jnp
import numpy as np
from jax.experimental import pallas as pl
from jax.experimental.pallas import tpu as pltpu

CHANNELS = [3, 12, 16, 24, 48]
BN_EPS = 1e-5


# ---------------------------------------------------------------------------
# Pallas kernel: whole encoder (4 stages), one grid step per batch sample.
# ---------------------------------------------------------------------------
def _encoder_kernel(x_ref,
                    r1, t1, b1, r2, t2, b2, r3, t3, b3, r4, t4, b4,
                    o1, o2, o3, o4):
    a = x_ref[0]  # (H, W*Cin) f32 activation slab for this sample
    stages = ((r1, t1, b1, o1), (r2, t2, b2, o2),
              (r3, t3, b3, o3), (r4, t4, b4, o4))
    for r_ref, t_ref, b_ref, o_ref in stages:
        ho = r_ref.shape[0] // 5     # output rows of this stage
        lin = t_ref.shape[0] // 5    # W*Cin of this stage's input
        # Row selection (incl. reflect pad + stride-2 along H) for all 5 kh taps
        # in one MXU matmul:  z[kh*ho+i, :] = a[reflect(2i+kh-2), :]
        z = jnp.dot(r_ref[...], a, preferred_element_type=jnp.float32)
        acc = None
        for kh in range(5):
            # T_kh folds reflect pad + stride-2 along W, both convs and the BN
            # scale into one block-Toeplitz matrix (host-precomputed constant).
            part = jnp.dot(z[kh * ho:(kh + 1) * ho, :],
                           t_ref[kh * lin:(kh + 1) * lin, :],
                           preferred_element_type=jnp.float32)
            acc = part if acc is None else acc + part
        a = jnp.maximum(acc + b_ref[...], 0.0)      # (ho, wo*Cout), stays f32
        o_ref[0] = a.astype(o_ref.dtype)            # bf16 writeback


def _encoder_call(x_slab, consts, out_dims):
    n, h, lc = x_slab.shape
    in_specs = [pl.BlockSpec((1, h, lc), lambda i: (i, 0, 0))]
    args = [x_slab]
    for (r, t, b) in consts:
        in_specs.append(pl.BlockSpec(r.shape, lambda i: (0, 0)))
        in_specs.append(pl.BlockSpec(t.shape, lambda i: (0, 0)))
        in_specs.append(pl.BlockSpec(b.shape, lambda i: (0, 0)))
        args += [r, t, b]
    out_shape = tuple(jax.ShapeDtypeStruct((n, ho, wc), jnp.bfloat16)
                      for (ho, wc) in out_dims)
    out_specs = tuple(pl.BlockSpec((1, ho, wc), lambda i: (i, 0, 0))
                      for (ho, wc) in out_dims)
    return pl.pallas_call(
        _encoder_kernel,
        out_shape=out_shape,
        grid_spec=pltpu.PrefetchScalarGridSpec(
            num_scalar_prefetch=0,
            grid=(n,),
            in_specs=in_specs,
            out_specs=out_specs,
        ),
        compiler_params=pltpu.CompilerParams(
            dimension_semantics=("parallel",)),
    )(*args)


# ---------------------------------------------------------------------------
# Host-side folding of (reflect pad, stride-2, conv3+conv5, eval BN) into
# per-stage constants R (row selector), T (block-Toeplitz weights), bias.
# ---------------------------------------------------------------------------
def _reflect(v, ndim):
    if v < 0:
        return -v
    if v >= ndim:
        return 2 * (ndim - 1) - v
    return v


def _fold_stage(params, hs, ws):
    w3, w5, gamma, beta, rmean, rvar = [np.asarray(p, np.float32) for p in params]
    ch, cin = w3.shape[0], w3.shape[1]
    cout = 2 * ch
    ho, wo = hs // 2, ws // 2
    scale = gamma / np.sqrt(rvar + BN_EPS)
    bias = beta - rmean * scale
    # 3x3 kernel embedded at the centre of a 5x5 window (reflect indices for
    # pad=1 and pad=2 coincide on the shared taps), torch.cat([x0, x1], dim=1)
    # output-channel order, BN scale folded into the weights.
    w3e = np.zeros((ch, cin, 5, 5), np.float32)
    w3e[:, :, 1:4, 1:4] = w3
    wc = np.concatenate([w3e, w5], axis=0)               # (cout, cin, 5, 5)
    wc = np.transpose(wc, (2, 3, 1, 0)) * scale          # (kh, kw, cin, cout)

    t = np.zeros((5, ws * cin, wo * cout), np.float32)
    for kh in range(5):
        for j in range(wo):
            for kw in range(5):
                w = _reflect(2 * j + kw - 2, ws)
                t[kh, w * cin:(w + 1) * cin, j * cout:(j + 1) * cout] += wc[kh, kw]
    r = np.zeros((5, ho, hs), np.float32)
    for kh in range(5):
        for i in range(ho):
            r[kh, i, _reflect(2 * i + kh - 2, hs)] = 1.0
    bias_row = np.tile(bias, wo)[None, :]                # (1, wo*cout)
    return (jnp.asarray(r.reshape(5 * ho, hs)),
            jnp.asarray(t.reshape(5 * ws * cin, wo * cout)),
            jnp.asarray(bias_row))


def prepare_encoder(all_params, h, w):
    consts, dims = [], []
    hs, ws = h, w
    for p in all_params:
        assert hs >= 3 and ws >= 3 and hs % 2 == 0 and ws % 2 == 0, (hs, ws)
        consts.append(_fold_stage(p, hs, ws))
        cout = 2 * p[0].shape[0]
        hs, ws = hs // 2, ws // 2
        dims.append((hs, ws, cout))
    return consts, dims


def vfs_forward(x_nchw, consts, dims):
    n, c, h, w = x_nchw.shape
    x_slab = jnp.transpose(x_nchw, (0, 2, 3, 1)).reshape(n, h, w * c)
    outs = _encoder_call(x_slab.astype(jnp.float32), consts,
                         [(ho, wo * co) for (ho, wo, co) in dims])
    feats = []
    for o, (ho, wo, co) in zip(outs, dims):
        f = o.reshape(n, ho, wo, co).astype(jnp.float32)
        feats.append(jnp.transpose(f, (0, 3, 1, 2)))     # back to NCHW
    return [x_nchw] + feats


# ---------------------------------------------------------------------------
# Parameters and pure-JAX f32 reference (loose numerical cross-check)
# ---------------------------------------------------------------------------
def init_params(depth=4, key=None):
    if key is None:
        key = jax.random.PRNGKey(0)
    all_params = []
    for i in range(1, depth + 1):
        cin, cout = CHANNELS[i - 1], CHANNELS[i]
        ch = cout // 2
        key, k3, k5, kg, kb, km, kv = jax.random.split(key, 7)
        w3 = jax.random.normal(k3, (ch, cin, 3, 3), jnp.float32) / jnp.sqrt(9.0 * cin)
        w5 = jax.random.normal(k5, (ch, cin, 5, 5), jnp.float32) / jnp.sqrt(25.0 * cin)
        gamma = 1.0 + 0.1 * jax.random.normal(kg, (cout,), jnp.float32)
        beta = 0.1 * jax.random.normal(kb, (cout,), jnp.float32)
        rmean = 0.05 * jax.random.normal(km, (cout,), jnp.float32)
        rvar = jnp.abs(1.0 + 0.1 * jax.random.normal(kv, (cout,), jnp.float32))
        all_params.append((w3, w5, gamma, beta, rmean, rvar))
    return all_params


def _ref_stage(x_nchw, params):
    w3, w5, gamma, beta, rmean, rvar = params

    def conv(x, w, pad):
        xp = jnp.pad(x, ((0, 0), (0, 0), (pad, pad), (pad, pad)), mode="reflect")
        return jax.lax.conv_general_dilated(
            xp, w, (2, 2), "VALID", dimension_numbers=("NCHW", "OIHW", "NCHW"))

    y = jnp.concatenate([conv(x_nchw, w3, 1), conv(x_nchw, w5, 2)], axis=1)
    scale = gamma / jnp.sqrt(rvar + BN_EPS)
    bias = beta - rmean * scale
    y = y * scale[None, :, None, None] + bias[None, :, None, None]
    return jnp.maximum(y, 0.0)


if __name__ == "__main__":
    # Spatial 32 keeps reflect pads valid through 4 stride-2 stages
    # (32 -> 16 -> 8 -> 4 -> 2; pad=2 needs spatial >= 3 at every stage input).
    root = jax.random.PRNGKey(0)
    kx, kp = jax.random.split(root)
    x = jax.random.normal(kx, (2, 3, 32, 32), jnp.float32)
    params = init_params(depth=4, key=kp)

    consts, dims = prepare_encoder(params, 32, 32)
    fwd = jax.jit(lambda xx: vfs_forward(xx, consts, dims))
    outs = fwd(x)
    outs = [jax.block_until_ready(o) for o in outs]

    expected = [(2, 3, 32, 32), (2, 12, 16, 16), (2, 16, 8, 8),
                (2, 24, 4, 4), (2, 48, 2, 2)]
    assert [tuple(o.shape) for o in outs] == expected, \
        [tuple(o.shape) for o in outs]
    assert all(bool(jnp.all(jnp.isfinite(o))) for o in outs)
    assert all(float(o.min()) >= 0.0 for o in outs[1:])

    # Loose cross-check vs a pure-f32 JAX reference (kernel stores bf16 feats).
    ref = x
    for p, o in zip(params, outs[1:]):
        ref = _ref_stage(ref, p)
        err = float(jnp.max(jnp.abs(ref - o)))
        tol = 0.1 * max(1.0, float(jnp.max(jnp.abs(ref))))
        assert err < tol, (err, tol)

    print("KERNEL_OK")
</pallas_src>

<mosaic_0001>
module attributes {stable_mosaic.version = 11 : i64} {
  func.func @_encoder_kernel(%arg0: i32, %arg1: memref<1x32x96xf32, #tpu.memory_space<vmem>>, %arg2: memref<80x32xf32, #tpu.memory_space<vmem>>, %arg3: memref<480x192xf32, #tpu.memory_space<vmem>>, %arg4: memref<1x192xf32, #tpu.memory_space<vmem>>, %arg5: memref<40x16xf32, #tpu.memory_space<vmem>>, %arg6: memref<960x128xf32, #tpu.memory_space<vmem>>, %arg7: memref<1x128xf32, #tpu.memory_space<vmem>>, %arg8: memref<20x8xf32, #tpu.memory_space<vmem>>, %arg9: memref<640x96xf32, #tpu.memory_space<vmem>>, %arg10: memref<1x96xf32, #tpu.memory_space<vmem>>, %arg11: memref<10x4xf32, #tpu.memory_space<vmem>>, %arg12: memref<480x96xf32, #tpu.memory_space<vmem>>, %arg13: memref<1x96xf32, #tpu.memory_space<vmem>>, %arg14: memref<1x16x192xbf16, #tpu.memory_space<vmem>>, %arg15: memref<1x8x128xbf16, #tpu.memory_space<vmem>>, %arg16: memref<1x4x96xbf16, #tpu.memory_space<vmem>>, %arg17: memref<1x2x96xbf16, #tpu.memory_space<vmem>>) attributes {dimension_semantics = [#tpu.dimension_semantics<parallel>], iteration_bounds = array<i64: 2>, scalar_prefetch = 0 : i64, scratch_operands = 0 : i64, tpu.core_type = #tpu.core_type<tc>, window_params = [{transform_indices = @transform_0, window_bounds = array<i64: 1, 32, 96>}, {pipeline_mode = #tpu.pipeline_mode<synchronous>, transform_indices = @transform_1, window_bounds = array<i64: 80, 32>}, {pipeline_mode = #tpu.pipeline_mode<synchronous>, transform_indices = @transform_2, window_bounds = array<i64: 480, 192>}, {pipeline_mode = #tpu.pipeline_mode<synchronous>, transform_indices = @transform_3, window_bounds = array<i64: 1, 192>}, {pipeline_mode = #tpu.pipeline_mode<synchronous>, transform_indices = @transform_4, window_bounds = array<i64: 40, 16>}, {pipeline_mode = #tpu.pipeline_mode<synchronous>, transform_indices = @transform_5, window_bounds = array<i64: 960, 128>}, {pipeline_mode = #tpu.pipeline_mode<synchronous>, transform_indices = @transform_6, window_bounds = array<i64: 1, 128>}, {pipeline_mode = #tpu.pipeline_mode<synchronous>, transform_indices = @transform_7, window_bounds = array<i64: 20, 8>}, {pipeline_mode = #tpu.pipeline_mode<synchronous>, transform_indices = @transform_8, window_bounds = array<i64: 640, 96>}, {pipeline_mode = #tpu.pipeline_mode<synchronous>, transform_indices = @transform_9, window_bounds = array<i64: 1, 96>}, {pipeline_mode = #tpu.pipeline_mode<synchronous>, transform_indices = @transform_10, window_bounds = array<i64: 10, 4>}, {pipeline_mode = #tpu.pipeline_mode<synchronous>, transform_indices = @transform_11, window_bounds = array<i64: 480, 96>}, {pipeline_mode = #tpu.pipeline_mode<synchronous>, transform_indices = @transform_12, window_bounds = array<i64: 1, 96>}, {transform_indices = @transform_13, window_bounds = array<i64: 1, 16, 192>}, {transform_indices = @transform_14, window_bounds = array<i64: 1, 8, 128>}, {transform_indices = @transform_15, window_bounds = array<i64: 1, 4, 96>}, {transform_indices = @transform_16, window_bounds = array<i64: 1, 2, 96>}]} {
    %c0 = arith.constant 0 : index
    %c0_0 = arith.constant 0 : index
    %c0_1 = arith.constant 0 : index
    %0 = vector.load %arg1[%c0, %c0_0, %c0_1] : memref<1x32x96xf32, #tpu.memory_space<vmem>>, vector<1x32x96xf32>
    %1 = vector.shape_cast %0 : vector<1x32x96xf32> to vector<32x96xf32>
    %c0_2 = arith.constant 0 : index
    %c0_3 = arith.constant 0 : index
    %2 = vector.load %arg2[%c0_2, %c0_3] : memref<80x32xf32, #tpu.memory_space<vmem>>, vector<80x32xf32>
    %cst = arith.constant dense<0.000000e+00> : vector<80x96xf32>
    %3 = tpu.matmul %2, %1, %cst {dimension_numbers = #tpu.dot_dimension_numbers<[1], [0], [0], [1], [0, 0, 1, 1], [], []>} : vector<80x32xf32>, vector<32x96xf32>, vector<80x96xf32> -> vector<80x96xf32>
    %4 = vector.extract_strided_slice %3 {offsets = [0, 0], sizes = [16, 96], strides = [1, 1]} : vector<80x96xf32> to vector<16x96xf32>
    %c0_4 = arith.constant 0 : index
    %c0_5 = arith.constant 0 : index
    %5 = vector.load %arg3[%c0_4, %c0_5] : memref<480x192xf32, #tpu.memory_space<vmem>>, vector<96x192xf32>
    %cst_6 = arith.constant dense<0.000000e+00> : vector<16x192xf32>
    %6 = tpu.matmul %4, %5, %cst_6 {dimension_numbers = #tpu.dot_dimension_numbers<[1], [0], [0], [1], [0, 0, 1, 1], [], []>} : vector<16x96xf32>, vector<96x192xf32>, vector<16x192xf32> -> vector<16x192xf32>
    %7 = vector.extract_strided_slice %3 {offsets = [16, 0], sizes = [16, 96], strides = [1, 1]} : vector<80x96xf32> to vector<16x96xf32>
    %c96 = arith.constant 96 : index
    %c0_7 = arith.constant 0 : index
    %8 = vector.load %arg3[%c96, %c0_7] : memref<480x192xf32, #tpu.memory_space<vmem>>, vector<96x192xf32>
    %cst_8 = arith.constant dense<0.000000e+00> : vector<16x192xf32>
    %9 = tpu.matmul %7, %8, %cst_8 {dimension_numbers = #tpu.dot_dimension_numbers<[1], [0], [0], [1], [0, 0, 1, 1], [], []>} : vector<16x96xf32>, vector<96x192xf32>, vector<16x192xf32> -> vector<16x192xf32>
    %10 = arith.addf %6, %9 : vector<16x192xf32>
    %11 = vector.extract_strided_slice %3 {offsets = [32, 0], sizes = [16, 96], strides = [1, 1]} : vector<80x96xf32> to vector<16x96xf32>
    %c192 = arith.constant 192 : index
    %c0_9 = arith.constant 0 : index
    %12 = vector.load %arg3[%c192, %c0_9] : memref<480x192xf32, #tpu.memory_space<vmem>>, vector<96x192xf32>
    %cst_10 = arith.constant dense<0.000000e+00> : vector<16x192xf32>
    %13 = tpu.matmul %11, %12, %cst_10 {dimension_numbers = #tpu.dot_dimension_numbers<[1], [0], [0], [1], [0, 0, 1, 1], [], []>} : vector<16x96xf32>, vector<96x192xf32>, vector<16x192xf32> -> vector<16x192xf32>
    %14 = arith.addf %10, %13 : vector<16x192xf32>
    %15 = vector.extract_strided_slice %3 {offsets = [48, 0], sizes = [16, 96], strides = [1, 1]} : vector<80x96xf32> to vector<16x96xf32>
    %c288 = arith.constant 288 : index
    %c0_11 = arith.constant 0 : index
    %16 = vector.load %arg3[%c288, %c0_11] : memref<480x192xf32, #tpu.memory_space<vmem>>, vector<96x192xf32>
    %cst_12 = arith.constant dense<0.000000e+00> : vector<16x192xf32>
    %17 = tpu.matmul %15, %16, %cst_12 {dimension_numbers = #tpu.dot_dimension_numbers<[1], [0], [0], [1], [0, 0, 1, 1], [], []>} : vector<16x96xf32>, vector<96x192xf32>, vector<16x192xf32> -> vector<16x192xf32>
    %18 = arith.addf %14, %17 : vector<16x192xf32>
    %19 = vector.extract_strided_slice %3 {offsets = [64, 0], sizes = [16, 96], strides = [1, 1]} : vector<80x96xf32> to vector<16x96xf32>
    %c384 = arith.constant 384 : index
    %c0_13 = arith.constant 0 : index
    %20 = vector.load %arg3[%c384, %c0_13] : memref<480x192xf32, #tpu.memory_space<vmem>>, vector<96x192xf32>
    %cst_14 = arith.constant dense<0.000000e+00> : vector<16x192xf32>
    %21 = tpu.matmul %19, %20, %cst_14 {dimension_numbers = #tpu.dot_dimension_numbers<[1], [0], [0], [1], [0, 0, 1, 1], [], []>} : vector<16x96xf32>, vector<96x192xf32>, vector<16x192xf32> -> vector<16x192xf32>
    %22 = arith.addf %18, %21 : vector<16x192xf32>
    %c0_15 = arith.constant 0 : index
    %c0_16 = arith.constant 0 : index
    %23 = vector.load %arg4[%c0_15, %c0_16] : memref<1x192xf32, #tpu.memory_space<vmem>>, vector<1x192xf32>
    %24 = vector.broadcast %23 : vector<1x192xf32> to vector<16x192xf32>
    %25 = arith.addf %22, %24 : vector<16x192xf32>
    %cst_17 = arith.constant 0.000000e+00 : f32
    %26 = vector.broadcast %cst_17 : f32 to vector<16x192xf32>
    %27 = arith.maximumf %25, %26 : vector<16x192xf32>
    %28 = arith.truncf %27 : vector<16x192xf32> to vector<16x192xbf16>
    %c0_18 = arith.constant 0 : index
    %c0_19 = arith.constant 0 : index
    %c0_20 = arith.constant 0 : index
    %29 = vector.load %arg14[%c0_18, %c0_19, %c0_20] : memref<1x16x192xbf16, #tpu.memory_space<vmem>>, vector<1x16x192xbf16>
    %30 = vector.shape_cast %29 : vector<1x16x192xbf16> to vector<16x192xbf16>
    %31 = vector.shape_cast %28 : vector<16x192xbf16> to vector<1x16x192xbf16>
    tpu.vector_store %arg14[%c0_18, %c0_19, %c0_20], %31 {strides = array<i32>} : memref<1x16x192xbf16, #tpu.memory_space<vmem>>, vector<1x16x192xbf16>,
    %c0_21 = arith.constant 0 : index
    %c0_22 = arith.constant 0 : index
    %32 = vector.load %arg5[%c0_21, %c0_22] : memref<40x16xf32, #tpu.memory_space<vmem>>, vector<40x16xf32>
    %cst_23 = arith.constant dense<0.000000e+00> : vector<40x192xf32>
    %33 = tpu.matmul %32, %27, %cst_23 {dimension_numbers = #tpu.dot_dimension_numbers<[1], [0], [0], [1], [0, 0, 1, 1], [], []>} : vector<40x16xf32>, vector<16x192xf32>, vector<40x192xf32> -> vector<40x192xf32>
    %34 = vector.extract_strided_slice %33 {offsets = [0, 0], sizes = [8, 192], strides = [1, 1]} : vector<40x192xf32> to vector<8x192xf32>
    %c0_24 = arith.constant 0 : index
    %c0_25 = arith.constant 0 : index
    %35 = vector.load %arg6[%c0_24, %c0_25] : memref<960x128xf32, #tpu.memory_space<vmem>>, vector<192x128xf32>
    %cst_26 = arith.constant dense<0.000000e+00> : vector<8x128xf32>
    %36 = tpu.matmul %34, %35, %cst_26 {dimension_numbers = #tpu.dot_dimension_numbers<[1], [0], [0], [1], [0, 0, 1, 1], [], []>} : vector<8x192xf32>, vector<192x128xf32>, vector<8x128xf32> -> vector<8x128xf32>
    %37 = vector.extract_strided_slice %33 {offsets = [8, 0], sizes = [8, 192], strides = [1, 1]} : vector<40x192xf32> to vector<8x192xf32>
    %c192_27 = arith.constant 192 : index
    %c0_28 = arith.constant 0 : index
    %38 = vector.load %arg6[%c192_27, %c0_28] : memref<960x128xf32, #tpu.memory_space<vmem>>, vector<192x128xf32>
    %cst_29 = arith.constant dense<0.000000e+00> : vector<8x128xf32>
    %39 = tpu.matmul %37, %38, %cst_29 {dimension_numbers = #tpu.dot_dimension_numbers<[1], [0], [0], [1], [0, 0, 1, 1], [], []>} : vector<8x192xf32>, vector<192x128xf32>, vector<8x128xf32> -> vector<8x128xf32>
    %40 = arith.addf %36, %39 : vector<8x128xf32>
    %41 = vector.extract_strided_slice %33 {offsets = [16, 0], sizes = [8, 192], strides = [1, 1]} : vector<40x192xf32> to vector<8x192xf32>
    %c384_30 = arith.constant 384 : index
    %c0_31 = arith.constant 0 : index
    %42 = vector.load %arg6[%c384_30, %c0_31] : memref<960x128xf32, #tpu.memory_space<vmem>>, vector<192x128xf32>
    %cst_32 = arith.constant dense<0.000000e+00> : vector<8x128xf32>
    %43 = tpu.matmul %41, %42, %cst_32 {dimension_numbers = #tpu.dot_dimension_numbers<[1], [0], [0], [1], [0, 0, 1, 1], [], []>} : vector<8x192xf32>, vector<192x128xf32>, vector<8x128xf32> -> vector<8x128xf32>
    %44 = arith.addf %40, %43 : vector<8x128xf32>
    %45 = vector.extract_strided_slice %33 {offsets = [24, 0], sizes = [8, 192], strides = [1, 1]} : vector<40x192xf32> to vector<8x192xf32>
    %c576 = arith.constant 576 : index
    %c0_33 = arith.constant 0 : index
    %46 = vector.load %arg6[%c576, %c0_33] : memref<960x128xf32, #tpu.memory_space<vmem>>, vector<192x128xf32>
    %cst_34 = arith.constant dense<0.000000e+00> : vector<8x128xf32>
    %47 = tpu.matmul %45, %46, %cst_34 {dimension_numbers = #tpu.dot_dimension_numbers<[1], [0], [0], [1], [0, 0, 1, 1], [], []>} : vector<8x192xf32>, vector<192x128xf32>, vector<8x128xf32> -> vector<8x128xf32>
    %48 = arith.addf %44, %47 : vector<8x128xf32>
    %49 = vector.extract_strided_slice %33 {offsets = [32, 0], sizes = [8, 192], strides = [1, 1]} : vector<40x192xf32> to vector<8x192xf32>
    %c768 = arith.constant 768 : index
    %c0_35 = arith.constant 0 : index
    %50 = vector.load %arg6[%c768, %c0_35] : memref<960x128xf32, #tpu.memory_space<vmem>>, vector<192x128xf32>
    %cst_36 = arith.constant dense<0.000000e+00> : vector<8x128xf32>
    %51 = tpu.matmul %49, %50, %cst_36 {dimension_numbers = #tpu.dot_dimension_numbers<[1], [0], [0], [1], [0, 0, 1, 1], [], []>} : vector<8x192xf32>, vector<192x128xf32>, vector<8x128xf32> -> vector<8x128xf32>
    %52 = arith.addf %48, %51 : vector<8x128xf32>
    %c0_37 = arith.constant 0 : index
    %c0_38 = arith.constant 0 : index
    %53 = vector.load %arg7[%c0_37, %c0_38] : memref<1x128xf32, #tpu.memory_space<vmem>>, vector<1x128xf32>
    %54 = vector.broadcast %53 : vector<1x128xf32> to vector<8x128xf32>
    %55 = arith.addf %52, %54 : vector<8x128xf32>
    %cst_39 = arith.constant 0.000000e+00 : f32
    %56 = vector.broadcast %cst_39 : f32 to vector<8x128xf32>
    %57 = arith.maximumf %55, %56 : vector<8x128xf32>
    %58 = arith.truncf %57 : vector<8x128xf32> to vector<8x128xbf16>
    %c0_40 = arith.constant 0 : index
    %c0_41 = arith.constant 0 : index
    %c0_42 = arith.constant 0 : index
    %59 = vector.load %arg15[%c0_40, %c0_41, %c0_42] : memref<1x8x128xbf16, #tpu.memory_space<vmem>>, vector<1x8x128xbf16>
    %60 = vector.shape_cast %59 : vector<1x8x128xbf16> to vector<8x128xbf16>
    %61 = vector.shape_cast %58 : vector<8x128xbf16> to vector<1x8x128xbf16>
    tpu.vector_store %arg15[%c0_40, %c0_41, %c0_42], %61 {strides = array<i32>} : memref<1x8x128xbf16, #tpu.memory_space<vmem>>, vector<1x8x128xbf16>,
    %c0_43 = arith.constant 0 : index
    %c0_44 = arith.constant 0 : index
    %62 = vector.load %arg8[%c0_43, %c0_44] : memref<20x8xf32, #tpu.memory_space<vmem>>, vector<20x8xf32>
    %cst_45 = arith.constant dense<0.000000e+00> : vector<20x128xf32>
    %63 = tpu.matmul %62, %57, %cst_45 {dimension_numbers = #tpu.dot_dimension_numbers<[1], [0], [0], [1], [0, 0, 1, 1], [], []>} : vector<20x8xf32>, vector<8x128xf32>, vector<20x128xf32> -> vector<20x128xf32>
    %64 = vector.extract_strided_slice %63 {offsets = [0, 0], sizes = [4, 128], strides = [1, 1]} : vector<20x128xf32> to vector<4x128xf32>
    %c0_46 = arith.constant 0 : index
    %c0_47 = arith.constant 0 : index
    %65 = vector.load %arg9[%c0_46, %c0_47] : memref<640x96xf32, #tpu.memory_space<vmem>>, vector<128x96xf32>
    %cst_48 = arith.constant dense<0.000000e+00> : vector<4x96xf32>
    %66 = tpu.matmul %64, %65, %cst_48 {dimension_numbers = #tpu.dot_dimension_numbers<[1], [0], [0], [1], [0, 0, 1, 1], [], []>} : vector<4x128xf32>, vector<128x96xf32>, vector<4x96xf32> -> vector<4x96xf32>
    %67 = vector.extract_strided_slice %63 {offsets = [4, 0], sizes = [4, 128], strides = [1, 1]} : vector<20x128xf32> to vector<4x128xf32>
    %c128 = arith.constant 128 : index
    %c0_49 = arith.constant 0 : index
    %68 = vector.load %arg9[%c128, %c0_49] : memref<640x96xf32, #tpu.memory_space<vmem>>, vector<128x96xf32>
    %cst_50 = arith.constant dense<0.000000e+00> : vector<4x96xf32>
    %69 = tpu.matmul %67, %68, %cst_50 {dimension_numbers = #tpu.dot_dimension_numbers<[1], [0], [0], [1], [0, 0, 1, 1], [], []>} : vector<4x128xf32>, vector<128x96xf32>, vector<4x96xf32> -> vector<4x96xf32>
    %70 = arith.addf %66, %69 : vector<4x96xf32>
    %71 = vector.extract_strided_slice %63 {offsets = [8, 0], sizes = [4, 128], strides = [1, 1]} : vector<20x128xf32> to vector<4x128xf32>
    %c256 = arith.constant 256 : index
    %c0_51 = arith.constant 0 : index
    %72 = vector.load %arg9[%c256, %c0_51] : memref<640x96xf32, #tpu.memory_space<vmem>>, vector<128x96xf32>
    %cst_52 = arith.constant dense<0.000000e+00> : vector<4x96xf32>
    %73 = tpu.matmul %71, %72, %cst_52 {dimension_numbers = #tpu.dot_dimension_numbers<[1], [0], [0], [1], [0, 0, 1, 1], [], []>} : vector<4x128xf32>, vector<128x96xf32>, vector<4x96xf32> -> vector<4x96xf32>
    %74 = arith.addf %70, %73 : vector<4x96xf32>
    %75 = vector.extract_strided_slice %63 {offsets = [12, 0], sizes = [4, 128], strides = [1, 1]} : vector<20x128xf32> to vector<4x128xf32>
    %c384_53 = arith.constant 384 : index
    %c0_54 = arith.constant 0 : index
    %76 = vector.load %arg9[%c384_53, %c0_54] : memref<640x96xf32, #tpu.memory_space<vmem>>, vector<128x96xf32>
    %cst_55 = arith.constant dense<0.000000e+00> : vector<4x96xf32>
    %77 = tpu.matmul %75, %76, %cst_55 {dimension_numbers = #tpu.dot_dimension_numbers<[1], [0], [0], [1], [0, 0, 1, 1], [], []>} : vector<4x128xf32>, vector<128x96xf32>, vector<4x96xf32> -> vector<4x96xf32>
    %78 = arith.addf %74, %77 : vector<4x96xf32>
    %79 = vector.extract_strided_slice %63 {offsets = [16, 0], sizes = [4, 128], strides = [1, 1]} : vector<20x128xf32> to vector<4x128xf32>
    %c512 = arith.constant 512 : index
    %c0_56 = arith.constant 0 : index
    %80 = vector.load %arg9[%c512, %c0_56] : memref<640x96xf32, #tpu.memory_space<vmem>>, vector<128x96xf32>
    %cst_57 = arith.constant dense<0.000000e+00> : vector<4x96xf32>
    %81 = tpu.matmul %79, %80, %cst_57 {dimension_numbers = #tpu.dot_dimension_numbers<[1], [0], [0], [1], [0, 0, 1, 1], [], []>} : vector<4x128xf32>, vector<128x96xf32>, vector<4x96xf32> -> vector<4x96xf32>
    %82 = arith.addf %78, %81 : vector<4x96xf32>
    %c0_58 = arith.constant 0 : index
    %c0_59 = arith.constant 0 : index
    %83 = vector.load %arg10[%c0_58, %c0_59] : memref<1x96xf32, #tpu.memory_space<vmem>>, vector<1x96xf32>
    %84 = vector.broadcast %83 : vector<1x96xf32> to vector<4x96xf32>
    %85 = arith.addf %82, %84 : vector<4x96xf32>
    %cst_60 = arith.constant 0.000000e+00 : f32
    %86 = vector.broadcast %cst_60 : f32 to vector<4x96xf32>
    %87 = arith.maximumf %85, %86 : vector<4x96xf32>
    %88 = arith.truncf %87 : vector<4x96xf32> to vector<4x96xbf16>
    %c0_61 = arith.constant 0 : index
    %c0_62 = arith.constant 0 : index
    %c0_63 = arith.constant 0 : index
    %89 = vector.load %arg16[%c0_61, %c0_62, %c0_63] : memref<1x4x96xbf16, #tpu.memory_space<vmem>>, vector<1x4x96xbf16>
    %90 = vector.shape_cast %89 : vector<1x4x96xbf16> to vector<4x96xbf16>
    %91 = vector.shape_cast %88 : vector<4x96xbf16> to vector<1x4x96xbf16>
    tpu.vector_store %arg16[%c0_61, %c0_62, %c0_63], %91 {strides = array<i32>} : memref<1x4x96xbf16, #tpu.memory_space<vmem>>, vector<1x4x96xbf16>,
    %c0_64 = arith.constant 0 : index
    %c0_65 = arith.constant 0 : index
    %92 = vector.load %arg11[%c0_64, %c0_65] : memref<10x4xf32, #tpu.memory_space<vmem>>, vector<10x4xf32>
    %cst_66 = arith.constant dense<0.000000e+00> : vector<10x96xf32>
    %93 = tpu.matmul %92, %87, %cst_66 {dimension_numbers = #tpu.dot_dimension_numbers<[1], [0], [0], [1], [0, 0, 1, 1], [], []>} : vector<10x4xf32>, vector<4x96xf32>, vector<10x96xf32> -> vector<10x96xf32>
    %94 = vector.extract_strided_slice %93 {offsets = [0, 0], sizes = [2, 96], strides = [1, 1]} : vector<10x96xf32> to vector<2x96xf32>
    %c0_67 = arith.constant 0 : index
    %c0_68 = arith.constant 0 : index
    %95 = vector.load %arg12[%c0_67, %c0_68] : memref<480x96xf32, #tpu.memory_space<vmem>>, vector<96x96xf32>
    %cst_69 = arith.constant dense<0.000000e+00> : vector<2x96xf32>
    %96 = tpu.matmul %94, %95, %cst_69 {dimension_numbers = #tpu.dot_dimension_numbers<[1], [0], [0], [1], [0, 0, 1, 1], [], []>} : vector<2x96xf32>, vector<96x96xf32>, vector<2x96xf32> -> vector<2x96xf32>
    %97 = vector.extract_strided_slice %93 {offsets = [2, 0], sizes = [2, 96], strides = [1, 1]} : vector<10x96xf32> to vector<2x96xf32>
    %c96_70 = arith.constant 96 : index
    %c0_71 = arith.constant 0 : index
    %98 = vector.load %arg12[%c96_70, %c0_71] : memref<480x96xf32, #tpu.memory_space<vmem>>, vector<96x96xf32>
    %cst_72 = arith.constant dense<0.000000e+00> : vector<2x96xf32>
    %99 = tpu.matmul %97, %98, %cst_72 {dimension_numbers = #tpu.dot_dimension_numbers<[1], [0], [0], [1], [0, 0, 1, 1], [], []>} : vector<2x96xf32>, vector<96x96xf32>, vector<2x96xf32> -> vector<2x96xf32>
    %100 = arith.addf %96, %99 : vector<2x96xf32>
    %101 = vector.extract_strided_slice %93 {offsets = [4, 0], sizes = [2, 96], strides = [1, 1]} : vector<10x96xf32> to vector<2x96xf32>
    %c192_73 = arith.constant 192 : index
    %c0_74 = arith.constant 0 : index
    %102 = vector.load %arg12[%c192_73, %c0_74] : memref<480x96xf32, #tpu.memory_space<vmem>>, vector<96x96xf32>
    %cst_75 = arith.constant dense<0.000000e+00> : vector<2x96xf32>
    %103 = tpu.matmul %101, %102, %cst_75 {dimension_numbers = #tpu.dot_dimension_numbers<[1], [0], [0], [1], [0, 0, 1, 1], [], []>} : vector<2x96xf32>, vector<96x96xf32>, vector<2x96xf32> -> vector<2x96xf32>
    %104 = arith.addf %100, %103 : vector<2x96xf32>
    %105 = vector.extract_strided_slice %93 {offsets = [6, 0], sizes = [2, 96], strides = [1, 1]} : vector<10x96xf32> to vector<2x96xf32>
    %c288_76 = arith.constant 288 : index
    %c0_77 = arith.constant 0 : index
    %106 = vector.load %arg12[%c288_76, %c0_77] : memref<480x96xf32, #tpu.memory_space<vmem>>, vector<96x96xf32>
    %cst_78 = arith.constant dense<0.000000e+00> : vector<2x96xf32>
    %107 = tpu.matmul %105, %106, %cst_78 {dimension_numbers = #tpu.dot_dimension_numbers<[1], [0], [0], [1], [0, 0, 1, 1], [], []>} : vector<2x96xf32>, vector<96x96xf32>, vector<2x96xf32> -> vector<2x96xf32>
    %108 = arith.addf %104, %107 : vector<2x96xf32>
    %109 = vector.extract_strided_slice %93 {offsets = [8, 0], sizes = [2, 96], strides = [1, 1]} : vector<10x96xf32> to vector<2x96xf32>
    %c384_79 = arith.constant 384 : index
    %c0_80 = arith.constant 0 : index
    %110 = vector.load %arg12[%c384_79, %c0_80] : memref<480x96xf32, #tpu.memory_space<vmem>>, vector<96x96xf32>
    %cst_81 = arith.constant dense<0.000000e+00> : vector<2x96xf32>
    %111 = tpu.matmul %109, %110, %cst_81 {dimension_numbers = #tpu.dot_dimension_numbers<[1], [0], [0], [1], [0, 0, 1, 1], [], []>} : vector<2x96xf32>, vector<96x96xf32>, vector<2x96xf32> -> vector<2x96xf32>
    %112 = arith.addf %108, %111 : vector<2x96xf32>
    %c0_82 = arith.constant 0 : index
    %c0_83 = arith.constant 0 : index
    %113 = vector.load %arg13[%c0_82, %c0_83] : memref<1x96xf32, #tpu.memory_space<vmem>>, vector<1x96xf32>
    %114 = vector.broadcast %113 : vector<1x96xf32> to vector<2x96xf32>
    %115 = arith.addf %112, %114 : vector<2x96xf32>
    %cst_84 = arith.constant 0.000000e+00 : f32
    %116 = vector.broadcast %cst_84 : f32 to vector<2x96xf32>
    %117 = arith.maximumf %115, %116 : vector<2x96xf32>
    %118 = arith.truncf %117 : vector<2x96xf32> to vector<2x96xbf16>
    %c0_85 = arith.constant 0 : index
    %c0_86 = arith.constant 0 : index
    %c0_87 = arith.constant 0 : index
    %119 = vector.load %arg17[%c0_85, %c0_86, %c0_87] : memref<1x2x96xbf16, #tpu.memory_space<vmem>>, vector<1x2x96xbf16>
    %120 = vector.shape_cast %119 : vector<1x2x96xbf16> to vector<2x96xbf16>
    %121 = vector.shape_cast %118 : vector<2x96xbf16> to vector<1x2x96xbf16>
    tpu.vector_store %arg17[%c0_85, %c0_86, %c0_87], %121 {strides = array<i32>} : memref<1x2x96xbf16, #tpu.memory_space<vmem>>, vector<1x2x96xbf16>,
    return
  }
  func.func @transform_0(%arg0: i32) -> (i32, i32, i32) {
    %c0_i32 = arith.constant 0 : i32
    %c0_i32_0 = arith.constant 0 : i32
    %c0_i32_1 = arith.constant 0 : i32
    return %arg0, %c0_i32, %c0_i32_0 : i32, i32, i32
  }
  func.func @transform_1(%arg0: i32) -> (i32, i32) {
    %c0_i32 = arith.constant 0 : i32
    %c0_i32_0 = arith.constant 0 : i32
    %c0_i32_1 = arith.constant 0 : i32
    return %c0_i32, %c0_i32_0 : i32, i32
  }
  func.func @transform_2(%arg0: i32) -> (i32, i32) {
    %c0_i32 = arith.constant 0 : i32
    %c0_i32_0 = arith.constant 0 : i32
    %c0_i32_1 = arith.constant 0 : i32
    return %c0_i32, %c0_i32_0 : i32, i32
  }
  func.func @transform_3(%arg0: i32) -> (i32, i32) {
    %c0_i32 = arith.constant 0 : i32
    %c0_i32_0 = arith.constant 0 : i32
    %c0_i32_1 = arith.constant 0 : i32
    return %c0_i32, %c0_i32_0 : i32, i32
  }
  func.func @transform_4(%arg0: i32) -> (i32, i32) {
    %c0_i32 = arith.constant 0 : i32
    %c0_i32_0 = arith.constant 0 : i32
    %c0_i32_1 = arith.constant 0 : i32
    return %c0_i32, %c0_i32_0 : i32, i32
  }
  func.func @transform_5(%arg0: i32) -> (i32, i32) {
    %c0_i32 = arith.constant 0 : i32
    %c0_i32_0 = arith.constant 0 : i32
    %c0_i32_1 = arith.constant 0 : i32
    return %c0_i32, %c0_i32_0 : i32, i32
  }
  func.func @transform_6(%arg0: i32) -> (i32, i32) {
    %c0_i32 = arith.constant 0 : i32
    %c0_i32_0 = arith.constant 0 : i32
    %c0_i32_1 = arith.constant 0 : i32
    return %c0_i32, %c0_i32_0 : i32, i32
  }
  func.func @transform_7(%arg0: i32) -> (i32, i32) {
    %c0_i32 = arith.constant 0 : i32
    %c0_i32_0 = arith.constant 0 : i32
    %c0_i32_1 = arith.constant 0 : i32
    return %c0_i32, %c0_i32_0 : i32, i32
  }
  func.func @transform_8(%arg0: i32) -> (i32, i32) {
    %c0_i32 = arith.constant 0 : i32
    %c0_i32_0 = arith.constant 0 : i32
    %c0_i32_1 = arith.constant 0 : i32
    return %c0_i32, %c0_i32_0 : i32, i32
  }
  func.func @transform_9(%arg0: i32) -> (i32, i32) {
    %c0_i32 = arith.constant 0 : i32
    %c0_i32_0 = arith.constant 0 : i32
    %c0_i32_1 = arith.constant 0 : i32
    return %c0_i32, %c0_i32_0 : i32, i32
  }
  func.func @transform_10(%arg0: i32) -> (i32, i32) {
    %c0_i32 = arith.constant 0 : i32
    %c0_i32_0 = arith.constant 0 : i32
    %c0_i32_1 = arith.constant 0 : i32
    return %c0_i32, %c0_i32_0 : i32, i32
  }
  func.func @transform_11(%arg0: i32) -> (i32, i32) {
    %c0_i32 = arith.constant 0 : i32
    %c0_i32_0 = arith.constant 0 : i32
    %c0_i32_1 = arith.constant 0 : i32
    return %c0_i32, %c0_i32_0 : i32, i32
  }
  func.func @transform_12(%arg0: i32) -> (i32, i32) {
    %c0_i32 = arith.constant 0 : i32
    %c0_i32_0 = arith.constant 0 : i32
    %c0_i32_1 = arith.constant 0 : i32
    return %c0_i32, %c0_i32_0 : i32, i32
  }
  func.func @transform_13(%arg0: i32) -> (i32, i32, i32) {
    %c0_i32 = arith.constant 0 : i32
    %c0_i32_0 = arith.constant 0 : i32
    %c0_i32_1 = arith.constant 0 : i32
    return %arg0, %c0_i32, %c0_i32_0 : i32, i32, i32
  }
  func.func @transform_14(%arg0: i32) -> (i32, i32, i32) {
    %c0_i32 = arith.constant 0 : i32
    %c0_i32_0 = arith.constant 0 : i32
    %c0_i32_1 = arith.constant 0 : i32
    return %arg0, %c0_i32, %c0_i32_0 : i32, i32, i32
  }
  func.func @transform_15(%arg0: i32) -> (i32, i32, i32) {
    %c0_i32 = arith.constant 0 : i32
    %c0_i32_0 = arith.constant 0 : i32
    %c0_i32_1 = arith.constant 0 : i32
    return %arg0, %c0_i32, %c0_i32_0 : i32, i32, i32
  }
  func.func @transform_16(%arg0: i32) -> (i32, i32, i32) {
    %c0_i32 = arith.constant 0 : i32
    %c0_i32_0 = arith.constant 0 : i32
    %c0_i32_1 = arith.constant 0 : i32
    return %arg0, %c0_i32, %c0_i32_0 : i32, i32, i32
  }
}

</mosaic_0001>

<bundles_post_ra>
// kernel: _lambda_.1
= control target key start
LH: loop header
LB: loop body
LE: loop exit
PB: predicated region body
PF: predicated region fallthrough
CT: control target
= control target key end

     0   :  { %s5792_s0 = inlined_call_operand.vmem [shape: f32[2,32,96], index: 0, kind: input, shape index: {}]   ;;  %s5793_s1 = inlined_call_operand.hbm [shape: f32[80,32], index: 1, kind: input, shape index: {}]   ;;  %s5794_s2 = inlined_call_operand.hbm [shape: f32[480,192], index: 2, kind: input, shape index: {}]   ;;  %s5795_s3 = inlined_call_operand.hbm [shape: f32[1,192], index: 3, kind: input, shape index: {}]   ;;  %s5796_s4 = inlined_call_operand.vmem [shape: f32[40,16], index: 4, kind: input, shape index: {}]   ;;  %s5797_s5 = inlined_call_operand.hbm [shape: f32[960,128], index: 5, kind: input, shape index: {}]   ;;  %s5798_s6 = inlined_call_operand.vmem [shape: f32[1,128], index: 6, kind: input, shape index: {}]   ;;  %s5799_s7 = inlined_call_operand.hbm [shape: f32[20,8], index: 7, kind: input, shape index: {}]   ;;  %s5800_s8 = inlined_call_operand.vmem [shape: f32[640,96], index: 8, kind: input, shape index: {}]   ;;  %s5801_s9 = inlined_call_operand.hbm [shape: f32[1,96], index: 9, kind: input, shape index: {}]   ;;  %s5802_s10 = inlined_call_operand.hbm [shape: f32[10,4], index: 10, kind: input, shape index: {}]   ;;  %s5803_s11 = inlined_call_operand.hbm [shape: f32[480,96], index: 11, kind: input, shape index: {}]   ;;  %s5804_s12 = inlined_call_operand.hbm [shape: f32[1,96], index: 12, kind: input, shape index: {}]   ;;  %s5805_s13 = inlined_call_operand.vmem [shape: bf16[2,16,192], index: 13, kind: output, shape index: {0}]   ;;  %s5806_s14 = inlined_call_operand.vmem [shape: bf16[2,8,128], index: 14, kind: output, shape index: {1}]   ;;  %s5807_s15 = inlined_call_operand.vmem [shape: bf16[2,4,96], index: 15, kind: output, shape index: {2}]   ;;  %s5808_s16 = inlined_call_operand.vmem [shape: bf16[2,2,96], index: 16, kind: output, shape index: {3}]  }
   0x1   :  { %5812 = sst [smem:[#allocation22_spill]] %s5792_s0 }
   0x2   :  { %5813 = sst [smem:[#allocation23_spill]] %s5806_s14 }
   0x3   :  { %5814 = sst [smem:[#allocation24_spill]] %s5807_s15 }
   0x4   :  { %5815 = sst [smem:[#allocation25_spill]] %s5808_s16 }
   0x5   :  { %22 = vsyncpa [#allocation3], 0 }
   0x6   :  { %23 = vsyncpa [#allocation5], 0 }
   0x7   :  { %24 = vsyncpa [#allocation8], 0 }
   0x8   :  { %25 = vsyncpa [#allocation11], 0 }
   0x9   :  { %26 = vsyncpa [#allocation14], 0  ;;  %s4964_s21 = smov 0  }
   0xa LB: > { %5816 = sst [smem:[#allocation21_spill]] %s4861_s21  ;;  %s4863_s22 = smov [#allocation4]   ;;  %s4861_s21 = sphi %s4964_s21, %s32_s21  }
   0xb   : > { %s444_s23 = sshll.u32 %s4863_s22, 4  ;;  %s4970_s24 = sadd.s32 4294967295, %s4861_s21   ;;  %s4975_s23 = int_to_ptr.vmem [resolvable:$true] %s444_s23 }
   0xc   : > { %p3340_p0 = scmp.ge.s32.totalorder %s4861_s21, 1  ;;  %p419_p1 = scmp.lt.s32.totalorder %s4861_s21, 3 }
   0xd   : > { %p5810_p2 = scmp.eq.s32.totalorder %s4970_s24, 0  ;;  %s4864_s27 = smov [#allocation7]  }
   0xe   : > { %p4977_p3 = pnand %p3340_p0, %p419_p1  ;;  %s471_s28 = sshll.u32 %s4864_s27, 4  ;;  %s4989_s28 = int_to_ptr.vmem [resolvable:$true] %s471_s28 }
   0xf   : > { %s4865_s29 = smov [#allocation10]   ;;  %s4583_s18 = scalar_lea.hbm %s5794_s2, 15360 }
  0x10   : > { %s5817_s25 = scalar_select %p4977_p3, 1, 0 }
  0x11   : > { %p4513_p4 = pneg %p4977_p3  ;;  %s504_s30 = sshll.u32 %s4865_s29, 4  ;;  %s4991_s30 = int_to_ptr.vmem [resolvable:$true] %s504_s30 }
  0x12   : > { %p4584_p6 = scmp.ne.s32.totalorder %s5794_s2, %s4583_s18  ;;  %p4590_p10 = scmp.lt.u32.totalorder %s4583_s18, %s5794_s2 }
  0x13   : > { %p4985_p5 = pnand %p5810_p2, %p4513_p4 }
  0x15   : > { %p5001_p7 = pneg %p4985_p5 }
  0x17   : > { %p4586_p8 = pnand %p5001_p7, %p4584_p6 }
  0x19   : > { %p4587_p9 = pneg %p4586_p8 }
  0x1b   : > { %p4592_p11 = pnand %p4590_p10, %p4587_p9 }
  0x1d   : > { %4595 = shalt.err (!%p4592_p11)
}
  0x1e   : > { %s4596_s0 = scalar_lea.vmem %s4975_s23, 15360  ;;  %p4604_p1 = scmp.lt.s32.totalorder %s4975_s23, %s4975_s23 }
  0x1f   : > { %p4597_p12 = scmp.ne.s32.totalorder %s4975_s23, %s4596_s0  ;;  %p4605_p4 = scmp.lt.s32.totalorder %s4596_s0, %s4596_s0 }
  0x21   : > { %p4599_p13 = pnand %p4597_p12, %p5001_p7  ;;  %p4606_p6 = por %p4605_p4, %p4604_p1 }
  0x23   : > { %p4600_p0 = pneg %p4599_p13 }
  0x25   : > { %p4607_p8 = pnand %p4606_p6, %p4600_p0 }
  0x27   : > { %4610 = shalt.err (!%p4607_p8)
}
  0x28   : > { %s4866_s17 = smov 256   ;;  %s4867_s18 = smov 16  }
  0x29   : > { %4519 = dma.hbm_to_vmem [thread:$0]  (!%p4985_p5), %s5794_s2, 15360, %s4975_s23, [#allocation5], %s4866_s17, %s4866_s17, %s4867_s18  }
  0x2a   : > { %s4611_s21 = scalar_lea.hbm %s5797_s5, 15360 }
  0x2b   : > { %p4612_p9 = scmp.ne.s32.totalorder %s5797_s5, %s4611_s21  ;;  %p4618_p12 = scmp.lt.u32.totalorder %s4611_s21, %s5797_s5 }
  0x2d   : > { %p4614_p10 = pnand %p4612_p9, %p5001_p7 }
  0x2f   : > { %p4615_p11 = pneg %p4614_p10 }
  0x31   : > { %p4620_p13 = pnand %p4618_p12, %p4615_p11 }
  0x33   : > { %4623 = shalt.err (!%p4620_p13)
}
  0x34   : > { %s4624_s23 = scalar_lea.vmem %s4989_s28, 15360  ;;  %p4632_p6 = scmp.lt.s32.totalorder %s4989_s28, %s4989_s28 }
  0x35   : > { %p4625_p0 = scmp.ne.s32.totalorder %s4989_s28, %s4624_s23  ;;  %p4633_p8 = scmp.lt.s32.totalorder %s4624_s23, %s4624_s23 }
  0x37   : > { %p4627_p1 = pnand %p4625_p0, %p5001_p7  ;;  %p4634_p9 = por %p4633_p8, %p4632_p6 }
  0x39   : > { %p4628_p4 = pneg %p4627_p1 }
  0x3b   : > { %p4635_p10 = pnand %p4634_p9, %p4628_p4 }
  0x3d   : > { %4638 = shalt.err (!%p4635_p10)
}
  0x3e   : > { %s4868_s15 = smov 128   ;;  %s4869_s14 = smov 8  }
  0x3f   : > { %4525 = dma.hbm_to_vmem [thread:$0]  (!%p4985_p5), %s5797_s5, 15360, %s4989_s28, [#allocation8], %s4868_s15, %s4868_s15, %s4869_s14  }
  0x40   : > { %s4639_s19 = scalar_lea.hbm %s5801_s9, 16 }
  0x41   : > { %p4640_p11 = scmp.ne.s32.totalorder %s5801_s9, %s4639_s19  ;;  %p4646_p0 = scmp.lt.u32.totalorder %s4639_s19, %s5801_s9 }
  0x43   : > { %p4642_p12 = pnand %p4640_p11, %p5001_p7 }
  0x45   : > { %p4643_p13 = pneg %p4642_p12 }
  0x47   : > { %p4648_p1 = pnand %p4646_p0, %p4643_p13 }
  0x49   : > { %4651 = shalt.err (!%p4648_p1)
}
  0x4a   : > { %s4652_s28 = scalar_lea.vmem %s4991_s30, 16  ;;  %s4659_s23 = scalar_lea.vmem %s4991_s30, 32 }
  0x4b   : > { %p4653_p4 = scmp.ne.s32.totalorder %s4991_s30, %s4652_s28  ;;  %p4660_p9 = scmp.lt.s32.totalorder %s4991_s30, %s4991_s30 }
  0x4c   : > { %p4661_p10 = scmp.lt.s32.totalorder %s4659_s23, %s4652_s28 }
  0x4d   : > { %p4655_p6 = pnand %p4653_p4, %p5001_p7 }
  0x4e   : > { %p4662_p11 = por %p4661_p10, %p4660_p9 }
  0x4f   : > { %p4656_p8 = pneg %p4655_p6 }
  0x51   : > { %p4663_p12 = pnand %p4662_p11, %p4656_p8 }
  0x53   : > { %4666 = shalt.err (!%p4663_p12)
}
  0x54   : > { %4531 = dma.hbm_to_vmem [thread:$0]  (!%p4985_p5), %s5801_s9, 16, %s4991_s30, [#allocation11]  }
  0x55   : > { %s4870_s17 = smov [#allocation13]   ;;  %s4871_s19 = smov [#allocation2]  }
  0x56   : > { %s527_s18 = sshll.u32 %s4870_s17, 4  ;;  %s431_s20 = sshll.u32 %s4871_s19, 4  ;;  %s528_s18 = int_to_ptr.vmem [resolvable:$true] %s527_s18  ;;  %s5072_s20 = int_to_ptr.vmem [resolvable:$true] %s431_s20 }
  0x57   : > { %s4667_s0 = scalar_lea.hbm %s5803_s11, 7680 }
  0x58   : > { %p4668_p13 = scmp.ne.s32.totalorder %s5803_s11, %s4667_s0  ;;  %p4674_p4 = scmp.lt.u32.totalorder %s4667_s0, %s5803_s11 }
  0x5a   : > { %p4670_p0 = pnand %p4668_p13, %p5001_p7 }
  0x5c   : > { %p4671_p1 = pneg %p4670_p0 }
  0x5e   : > { %p4676_p6 = pnand %p4674_p4, %p4671_p1 }
  0x60   : > { %4679 = shalt.err (!%p4676_p6)
}
  0x61   : > { %s4680_s21 = scalar_lea.vmem %s528_s18, 7680  ;;  %p4688_p11 = scmp.lt.s32.totalorder %s528_s18, %s528_s18 }
  0x62   : > { %p4681_p8 = scmp.ne.s32.totalorder %s528_s18, %s4680_s21  ;;  %p4689_p12 = scmp.lt.s32.totalorder %s4680_s21, %s4680_s21 }
  0x64   : > { %p4683_p9 = pnand %p4681_p8, %p5001_p7  ;;  %p4690_p2 = por %p4689_p12, %p4688_p11 }
  0x66   : > { %p4684_p10 = pneg %p4683_p9 }
  0x68   : > { %p4691_p3 = pnand %p4690_p2, %p4684_p10 }
  0x6a   : > { %4694 = shalt.err (!%p4691_p3)
}
  0x6b   : > { %4537 = dma.hbm_to_vmem [thread:$0]  (!%p4985_p5), %s5803_s11, 7680, %s528_s18, [#allocation14], %s4868_s15, %s4868_s15, %s4869_s14  }
  0x6c   : > { %s4695_s0 = scalar_lea.hbm %s5793_s1, 1280 }
  0x6d   : > { %p4696_p13 = scmp.ne.s32.totalorder %s5793_s1, %s4695_s0  ;;  %p4702_p0 = scmp.lt.u32.totalorder %s4695_s0, %s5793_s1 }
  0x6f   : > { %p4698_p2 = pnand %p4696_p13, %p5001_p7 }
  0x71   : > { %p4699_p3 = pneg %p4698_p2 }
  0x73   : > { %p4704_p1 = pnand %p4702_p0, %p4699_p3 }
  0x75   : > { %4707 = shalt.err (!%p4704_p1)
}
  0x76   : > { %s4708_s18 = scalar_lea.vmem %s5072_s20, 1280  ;;  %p4716_p9 = scmp.lt.s32.totalorder %s5072_s20, %s5072_s20 }
  0x77   : > { %p4709_p4 = scmp.ne.s32.totalorder %s5072_s20, %s4708_s18  ;;  %p4717_p10 = scmp.lt.s32.totalorder %s4708_s18, %s4708_s18 }
  0x79   : > { %p4711_p6 = pnand %p4709_p4, %p5001_p7  ;;  %p4718_p11 = por %p4717_p10, %p4716_p9 }
  0x7b   : > { %p4712_p8 = pneg %p4711_p6 }
  0x7d   : > { %p4719_p12 = pnand %p4718_p11, %p4712_p8 }
  0x7f   : > { %4722 = shalt.err (!%p4719_p12)
}
  0x80   : > { %4516 = dma.hbm_to_vmem [thread:$0]  (!%p4985_p5), %s5793_s1, 1280, %s5072_s20, [#allocation3], %s4868_s15, %s4868_s15, %s4869_s14  }
  0x81   : > { %s4872_s19 = smov [#allocation6]   ;;  %s4873_s29 = smov [#allocation9]  }
  0x82   : > { %s458_s27 = sshll.u32 %s4872_s19, 4  ;;  %s487_s0 = sshll.u32 %s4873_s29, 4  ;;  %s459_s27 = int_to_ptr.vmem [resolvable:$true] %s458_s27  ;;  %s5121_s0 = int_to_ptr.vmem [resolvable:$true] %s487_s0 }
  0x83   : > { %s4723_s16 = scalar_lea.hbm %s5795_s3, 32 }
  0x84   : > { %p4724_p13 = scmp.ne.s32.totalorder %s5795_s3, %s4723_s16  ;;  %p4730_p0 = scmp.lt.u32.totalorder %s4723_s16, %s5795_s3 }
  0x86   : > { %p4726_p2 = pnand %p4724_p13, %p5001_p7 }
  0x88   : > { %p4727_p3 = pneg %p4726_p2 }
  0x8a   : > { %p4732_p1 = pnand %p4730_p0, %p4727_p3 }
  0x8c   : > { %4735 = shalt.err (!%p4732_p1)
}
  0x8d   : > { %s4736_s17 = scalar_lea.vmem %s459_s27, 32  ;;  %p4744_p9 = scmp.lt.s32.totalorder %s459_s27, %s459_s27 }
  0x8e   : > { %p4737_p4 = scmp.ne.s32.totalorder %s459_s27, %s4736_s17  ;;  %p4745_p10 = scmp.lt.s32.totalorder %s4736_s17, %s4736_s17 }
  0x90   : > { %p4739_p6 = pnand %p4737_p4, %p5001_p7  ;;  %p4746_p11 = por %p4745_p10, %p4744_p9 }
  0x92   : > { %p4740_p8 = pneg %p4739_p6 }
  0x94   : > { %p4747_p12 = pnand %p4746_p11, %p4740_p8 }
  0x96   : > { %4750 = shalt.err (!%p4747_p12)
}
  0x97   : > { %4522 = dma.hbm_to_vmem [thread:$0]  (!%p4985_p5), %s5795_s3, 32, %s459_s27, [#allocation5]  }
  0x98   : > { %s4751_s16 = scalar_lea.hbm %s5799_s7, 384 }
  0x99   : > { %p4752_p13 = scmp.ne.s32.totalorder %s5799_s7, %s4751_s16  ;;  %p4758_p0 = scmp.lt.u32.totalorder %s4751_s16, %s5799_s7 }
  0x9b   : > { %p4754_p2 = pnand %p4752_p13, %p5001_p7 }
  0x9d   : > { %p4755_p3 = pneg %p4754_p2 }
  0x9f   : > { %p4760_p1 = pnand %p4758_p0, %p4755_p3 }
  0xa1   : > { %4763 = shalt.err (!%p4760_p1)
}
  0xa2   : > { %s4764_s27 = scalar_lea.vmem %s5121_s0, 384  ;;  %p4772_p9 = scmp.lt.s32.totalorder %s5121_s0, %s5121_s0 }
  0xa3   : > { %p4765_p4 = scmp.ne.s32.totalorder %s5121_s0, %s4764_s27  ;;  %p4773_p10 = scmp.lt.s32.totalorder %s4764_s27, %s4764_s27 }
  0xa5   : > { %p4767_p6 = pnand %p4765_p4, %p5001_p7  ;;  %p4774_p11 = por %p4773_p10, %p4772_p9 }
  0xa7   : > { %p4768_p8 = pneg %p4767_p6 }
  0xa9   : > { %p4775_p12 = pnand %p4774_p11, %p4768_p8 }
  0xab   : > { %4778 = shalt.err (!%p4775_p12)
}
  0xac   : > { %4528 = dma.hbm_to_vmem [thread:$0]  (!%p4985_p5), %s5799_s7, 384, %s5121_s0, [#allocation8], %s4868_s15, %s4868_s15, %s4869_s14  }
  0xad   : > { %s4874_s29 = smov [#allocation12]   ;;  %s4875_s23 = smov [#allocation15]  }
  0xae   : > { %s514_s28 = sshll.u32 %s4874_s29, 4  ;;  %s541_s16 = sshll.u32 %s4875_s23, 4  ;;  %s515_s28 = int_to_ptr.vmem [resolvable:$true] %s514_s28  ;;  %s5167_s16 = int_to_ptr.vmem [resolvable:$true] %s541_s16 }
  0xaf   : > { %s4779_s21 = scalar_lea.hbm %s5802_s10, 256 }
  0xb0   : > { %p4780_p13 = scmp.ne.s32.totalorder %s5802_s10, %s4779_s21  ;;  %p4786_p0 = scmp.lt.u32.totalorder %s4779_s21, %s5802_s10 }
  0xb2   : > { %p4782_p2 = pnand %p4780_p13, %p5001_p7 }
  0xb4   : > { %p4783_p3 = pneg %p4782_p2 }
  0xb6   : > { %p4788_p1 = pnand %p4786_p0, %p4783_p3 }
  0xb8   : > { %4791 = shalt.err (!%p4788_p1)
}
  0xb9   : > { %s4792_s19 = scalar_lea.vmem %s515_s28, 256  ;;  %p4800_p9 = scmp.lt.s32.totalorder %s515_s28, %s515_s28 }
  0xba   : > { %p4793_p4 = scmp.ne.s32.totalorder %s515_s28, %s4792_s19  ;;  %p4801_p10 = scmp.lt.s32.totalorder %s4792_s19, %s4792_s19 }
  0xbc   : > { %p4795_p6 = pnand %p4793_p4, %p5001_p7  ;;  %p4802_p11 = por %p4801_p10, %p4800_p9 }
  0xbe   : > { %p4796_p8 = pneg %p4795_p6 }
  0xc0   : > { %p4803_p12 = pnand %p4802_p11, %p4796_p8 }
  0xc2   : > { %4806 = shalt.err (!%p4803_p12)
}
  0xc3   : > { %4534 = dma.hbm_to_vmem [thread:$0]  (!%p4985_p5), %s5802_s10, 256, %s515_s28, [#allocation11], %s4868_s15, %s4868_s15, %s4869_s14  }
  0xc4   : > { %s4807_s21 = scalar_lea.hbm %s5804_s12, 16 }
  0xc5   : > { %p4808_p13 = scmp.ne.s32.totalorder %s5804_s12, %s4807_s21  ;;  %p4814_p0 = scmp.lt.u32.totalorder %s4807_s21, %s5804_s12 }
  0xc7   : > { %p4810_p2 = pnand %p4808_p13, %p5001_p7 }
  0xc9   : > { %p4811_p3 = pneg %p4810_p2 }
  0xcb   : > { %p4816_p1 = pnand %p4814_p0, %p4811_p3 }
  0xcd   : > { %4819 = shalt.err (!%p4816_p1)
}
  0xce   : > { %s4820_s15 = scalar_lea.vmem %s5167_s16, 16  ;;  %s4827_s14 = scalar_lea.vmem %s5167_s16, 32 }
  0xcf   : > { %p4821_p4 = scmp.ne.s32.totalorder %s5167_s16, %s4820_s15  ;;  %p4828_p9 = scmp.lt.s32.totalorder %s5167_s16, %s5167_s16 }
  0xd0   : > { %p4829_p10 = scmp.lt.s32.totalorder %s4827_s14, %s4820_s15 }
  0xd1   : > { %p4823_p6 = pnand %p4821_p4, %p5001_p7 }
  0xd2   : > { %p4830_p11 = por %p4829_p10, %p4828_p9 }
  0xd3   : > { %p4824_p8 = pneg %p4823_p6 }
  0xd5   : > { %p4831_p12 = pnand %p4830_p11, %p4824_p8 }
  0xd7   : > { %4834 = shalt.err (!%p4831_p12)
}
  0xd8   : > { %4540 = dma.hbm_to_vmem [thread:$0]  (!%p4985_p5), %s5804_s12, 16, %s5167_s16, [#allocation14]  }
  0xd9   : > { %p5820_p13 = scmp.ne.s32.totalorder %s5817_s25, 0 }
  0xda   : > { %p5821_p7 = scmp.eq.s32.totalorder (!%p5820_p13), %s4970_s24, 0 }
  0xdb   : > { %562 = sbr.rel (%p5820_p13) target bundleno = 2317 (0x90d), region = 72 }
  0xe2   : > { %4840 = dma.done.wait (%p5821_p7), [#allocation3], 1280   ;;  %p5822_p2 = pmov %p5821_p7 }
  0xe4   : > { %4842 = vsyncadd (%p5822_p2), [#allocation3], 4294966016  ;;  %p5823_p3 = pmov %p5822_p2 }
  0xe5   : > { %p5824_p0 = pmov %p5822_p2 }
  0xe6   : > { %4844 = dma.done.wait (%p5823_p3), [#allocation5], 15392  }
  0xe7   : > { %4846 = vsyncadd (%p5824_p0), [#allocation5], 4294951904  ;;  %p5825_p1 = pmov %p5824_p0 }
  0xe8   : > { %p5826_p5 = pmov %p5824_p0 }
  0xe9   : > { %4848 = dma.done.wait (%p5825_p1), [#allocation8], 15744  }
  0xea   : > { %4850 = vsyncadd (%p5826_p5), [#allocation8], 4294951552  ;;  %p5827_p4 = pmov %p5824_p0 }
  0xeb   : > { %p5828_p6 = pmov %p5824_p0 }
  0xec   : > { %4852 = dma.done.wait (%p5827_p4), [#allocation11], 272  }
  0xed   : > { %4854 = vsyncadd (%p5828_p6), [#allocation11], 4294967024  ;;  %p5829_p8 = pmov %p5824_p0 }
  0xee   : > { %p5830_p9 = pmov %p5824_p0 }
  0xef   : > { %4856 = dma.done.wait (%p5829_p8), [#allocation14], 7696  }
  0xf0   : > { %4858 = vsyncadd (%p5830_p9), [#allocation14], 4294959600  ;;  %p655_p10 = scmp.lt.s32.totalorder %s4970_s24, 1  ;;  %s5831_s16 = sld [smem:[#allocation22_spill]]  ;;  %vm690_vm0 = vcmask 261120   ;;  %v680_v5 = vld [vmem:[#allocation2] sm:$0xff] }
  0xf1   : > { %3598 = vmatprep.mubr.msk.f32.mxu1 %vm690_vm0, %v680_v5  ;;  %v861_v7 = vld [vmem:[#allocation4 + $0xc8] sm:$0xff]  ;;  %v863_v8 = vld [vmem:[#allocation4 + $0xd8] sm:$0xff]  ;;  %v860_v9 = vld [vmem:[#allocation4 + $0xc0] sm:$0xff]  ;;  %v4876_v55 = vmov 0.0   ;;  %vm884_vm1 = vcmask 785408   ;;  %vm1416_vm2 = vcmask 1043456  }
  0xf2   : > { %s5837_s24 = smov (!%p655_p10, %s4970_s24), 1  ;;  %v862_v10 = vld [vmem:[#allocation4 + $0xd0] sm:$0xff]  ;;  %v3947_v11 = vpack.c.bf16 %v863_v8, %v861_v7  ;;  %v865_v12 = vld [vmem:[#allocation4 + $0xe8] sm:$0xff]  ;;  %v867_v13 = vld [vmem:[#allocation4 + $0xf8] sm:$0xff]  ;;  %1506 = vmatprep.mubr.f32.mxu0 %v4876_v55  ;;  %vm1417_vm3 = vcmask 523268   ;;  %vm1426_vm5 = vcmask 130048  }
  0xf3   : > { %s3415_s25 = sshll.u32 %s5837_s24, 5  ;;  %v681_v14 = vld [vmem:[#allocation2 + $0x8] sm:$0xff]  ;;  %v3949_v15 = vpack.c.bf16 %v862_v10, %v860_v9  ;;  %v682_v16 = vld [vmem:[#allocation2 + $0x10] sm:$0xff]  ;;  %v3951_v17 = vpack.c.bf16 %v867_v13, %v865_v12  ;;  %v866_v19 = vld [vmem:[#allocation4 + $0xf0] sm:$0xff]  ;;  %s3416_s23 = sshll.u32 %s5837_s24, 4  ;;  %vm1585_vm6 = vcmask 523264  }
  0xf4   : > { %v864_v18 = vld [vmem:[#allocation4 + $0xe0] sm:$0xff]  ;;  %v869_v20 = vld [vmem:[#allocation4 + $0x108] sm:$0xff]  ;;  %v871_v21 = vld [vmem:[#allocation4 + $0x118] sm:$0xff]  ;;  %s664_s21 = scalar_lea.vmem %s5805_s13, %s3416_s23  ;;  %vm4878_vm7 = vmmov 0   ;;  %vm2040_vm8 = vcmask 64512   ;;  %s5832_s17 = sld [smem:[#allocation23_spill]] }
  0xf5   : > { %v683_v22 = vld [vmem:[#allocation2 + $0x18] sm:$0xff]  ;;  %v3953_v23 = vpack.c.bf16 %v866_v19, %v864_v18  ;;  %v684_v24 = vld [vmem:[#allocation2 + $0x20] sm:$0xff]  ;;  %v3955_v25 = vpack.c.bf16 %v871_v21, %v869_v20  ;;  %v868_v26 = vld [vmem:[#allocation4 + $0x100] sm:$0xff]  ;;  %vm2583_vm9 = vcmask 31744   ;;  %s3366_s19 = sshll.u32 %s5837_s24, 1  ;;  %s5833_s22 = sld [smem:[#allocation24_spill]] }
  0xf6   : > { %s659_s29 = scalar_lea.vmem %s5831_s16, %s3415_s25  ;;  %v870_v27 = vld [vmem:[#allocation4 + $0x110] sm:$0xff]  ;;  %v873_v28 = vld [vmem:[#allocation4 + $0x128] sm:$0xff]  ;;  %v875_v29 = vld [vmem:[#allocation4 + $0x138] sm:$0xff]  ;;  %vm2579_vm10 = vcmask 779264   ;;  %s5834_s30 = sld [smem:[#allocation25_spill]]  ;;  %vm3106_vm11 = vcmask 778240  }
  0xf7   : > { %v676_v0 = vld [vmem:[%s659_s29] sm:$0xff]  ;;  %v677_v1 = vld [vmem:[%s659_s29 + $0x8] sm:$0xff]  ;;  %v678_v2 = vld [vmem:[%s659_s29 + $0x10] sm:$0xff]  ;;  %v3957_v31 = vpack.c.bf16 %v870_v27, %v868_v26  ;;  %v3959_v33 = vpack.c.bf16 %v875_v29, %v873_v28 }
  0xf8   : > { %v3939_v3 = vpack.c.bf16 %v677_v1, %v676_v0  ;;  %v679_v4 = vld [vmem:[%s659_s29 + $0x18] sm:$0xff]  ;;  %v685_v30 = vld [vmem:[#allocation2 + $0x28] sm:$0xff]  ;;  %v686_v32 = vld [vmem:[#allocation2 + $0x30] sm:$0xff] }
  0xf9   : > { %v3943_v6 = vpack.c.bf16 %v679_v4, %v678_v2  ;;  %v872_v34 = vld [vmem:[#allocation4 + $0x120] sm:$0xff]  ;;  %v874_v35 = vld [vmem:[#allocation4 + $0x130] sm:$0xff]  ;;  %v877_v36 = vld [vmem:[#allocation4 + $0x148] sm:$0xff] }
  0xfa   : > { %3940 = vmatprep.subr.bf16.mxu1 %v3939_v3  ;;  %v879_v37 = vld [vmem:[#allocation4 + $0x158] sm:$0xff]  ;;  %v687_v38 = vld [vmem:[#allocation2 + $0x38] sm:$0xff]  ;;  %v3961_v39 = vpack.c.bf16 %v874_v35, %v872_v34  ;;  %v688_v40 = vld [vmem:[#allocation2 + $0x40] sm:$0xff] }
  0xfb   : > { %3942 = vmatpush3.bf16.msra.mxu1 %v3939_v3  ;;  %v3963_v41 = vpack.c.bf16 %v879_v37, %v877_v36  ;;  %v876_v42 = vld [vmem:[#allocation4 + $0x140] sm:$0xff]  ;;  %v878_v43 = vld [vmem:[#allocation4 + $0x150] sm:$0xff]  ;;  %v689_v44 = vld [vmem:[#allocation2 + $0x48] sm:$0xff]  ;;  %s672_s16 = scalar_lea.vmem %s5833_s22, %s3366_s19 }
  0xfc   : > { %3944 = vmatprep.subr.bf16.mxu1 %v3943_v6  ;;  %v3965_v45 = vpack.c.bf16 %v878_v43, %v876_v42  ;;  %v881_v46 = vld [vmem:[#allocation4 + $0x168] sm:$0xff]  ;;  %v883_v47 = vld [vmem:[#allocation4 + $0x178] sm:$0xff]  ;;  %v880_v49 = vld [vmem:[#allocation4 + $0x160] sm:$0xff]  ;;  %s675_s18 = scalar_lea.vmem %s5834_s30, %s5837_s24 }
  0xfd   : > { %v3967_v48 = vpack.c.bf16 %v883_v47, %v881_v46  ;;  %v882_v50 = vld [vmem:[#allocation4 + $0x170] sm:$0xff]  ;;  %v837_v52 = vld [vmem:[#allocation4 + $0x8] sm:$0xff]  ;;  %v839_v53 = vld [vmem:[#allocation4 + $0x18] sm:$0xff] }
  0xfe   : > { %v3969_v51 = vpack.c.bf16 %v882_v50, %v880_v49  ;;  %v3971_v54 = vpack.c.bf16 %v839_v53, %v837_v52  ;;  %v836_v57 = vld [vmem:[#allocation4] sm:$0xff]  ;;  %v838_v58 = vld [vmem:[#allocation4 + $0x10] sm:$0xff]  ;;  %v841_v60 = vld [vmem:[#allocation4 + $0x28] sm:$0xff] }
  0xff   : > { %3946 = vmatpush3.bf16.msra.mxu1 %v3943_v6  ;;  %v843_v61 = vld [vmem:[#allocation4 + $0x38] sm:$0xff]  ;;  %v3973_v62 = vpack.c.bf16 %v838_v58, %v836_v57  ;;  %v840_v1 = vld [vmem:[#allocation4 + $0x20] sm:$0xff]  ;;  %v842_v2 = vld [vmem:[#allocation4 + $0x30] sm:$0xff] }
 0x100   : > { %3948 = vmatprep.subr.bf16.mxu1 %v3947_v11  ;;  %v3975_v0 = vpack.c.bf16 %v843_v61, %v841_v60  ;;  %v845_v4 = vld [vmem:[#allocation4 + $0x48] sm:$0xff]  ;;  %v847_v5 = vld [vmem:[#allocation4 + $0x58] sm:$0xff]  ;;  %v3977_v6 = vpack.c.bf16 %v842_v2, %v840_v1  ;;  %v844_v8 = vld [vmem:[#allocation4 + $0x40] sm:$0xff] }
 0x101   : > { %v3979_v7 = vpack.c.bf16 %v847_v5, %v845_v4  ;;  %v846_v9 = vld [vmem:[#allocation4 + $0x50] sm:$0xff]  ;;  %v849_v11 = vld [vmem:[#allocation4 + $0x68] sm:$0xff]  ;;  %v851_v12 = vld [vmem:[#allocation4 + $0x78] sm:$0xff] }
 0x102   : > { %3599 = vmatmul.mubr.msk.f32.vlgmr.msra.gmra.mrb[0].mxu1 %vm690_vm0, %v681_v14  ;;  %v3981_v14 = vpack.c.bf16 %v846_v9, %v844_v8  ;;  %v853_v19 = vld [vmem:[#allocation4 + $0x88] sm:$0xff]  ;;  %v855_v20 = vld [vmem:[#allocation4 + $0x98] sm:$0xff]  ;;  %v1059_v50 = vld [vmem:[#allocation4 + $0x1c0] sm:$0xff] }
 0x103   : > { %3601 = vmatprep.mubr.msk.f32.mxu1 %vm690_vm0, %v682_v16  ;;  %3950 = vmatpush1.bf16.msra.mxu1 %v3949_v15  ;;  %v3983_v15 = vpack.c.bf16 %v851_v12, %v849_v11  ;;  %v848_v16 = vld [vmem:[#allocation4 + $0x60] sm:$0xff]  ;;  %v857_v27 = vld [vmem:[#allocation4 + $0xa8] sm:$0xff]  ;;  %v859_v28 = vld [vmem:[#allocation4 + $0xb8] sm:$0xff] }
 0x104   : > { %3952 = vmatprep.subr.bf16.mxu1 %v3951_v17  ;;  %v850_v17 = vld [vmem:[#allocation4 + $0x70] sm:$0xff]  ;;  %v1052_v34 = vld [vmem:[#allocation4 + $0x188] sm:$0xff]  ;;  %v1054_v35 = vld [vmem:[#allocation4 + $0x198] sm:$0xff] }
 0x105   : > { %v3995_v37 = vpack.c.bf16 %v1054_v35, %v1052_v34  ;;  %v1060_v46 = vld [vmem:[#allocation4 + $0x1c8] sm:$0xff]  ;;  %v1062_v47 = vld [vmem:[#allocation4 + $0x1d8] sm:$0xff]  ;;  %v1063_v58 = vld [vmem:[#allocation4 + $0x1e0] sm:$0xff] }
 0x106   : > { %3602 = vmatmul.mubr.msk.f32.gmra.mrb[2].mxu1 %vm690_vm0, %v683_v22  ;;  %v3985_v22 = vpack.c.bf16 %v850_v17, %v848_v16  ;;  %v4003_v49 = vpack.c.bf16 %v1062_v47, %v1060_v46  ;;  %v1064_v52 = vld [vmem:[#allocation4 + $0x1e8] sm:$0xff]  ;;  %v1066_v53 = vld [vmem:[#allocation4 + $0x1f8] sm:$0xff]  ;;  %v1069_v1 = vld [vmem:[#allocation4 + $0x210] sm:$0xff] }
 0x107   : > { %3604 = vmatprep.mubr.msk.f32.mxu1 %vm690_vm0, %v684_v24  ;;  %3954 = vmatpush1.bf16.msra.mxu1 %v3953_v23  ;;  %v3987_v23 = vpack.c.bf16 %v855_v20, %v853_v19  ;;  %v852_v24 = vld [vmem:[#allocation4 + $0x80] sm:$0xff]  ;;  %v4007_v57 = vpack.c.bf16 %v1066_v53, %v1064_v52  ;;  %v1068_v60 = vld [vmem:[#allocation4 + $0x208] sm:$0xff]  ;;  %v1070_v61 = vld [vmem:[#allocation4 + $0x218] sm:$0xff] }
 0x108   : > { %3956 = vmatprep.subr.bf16.mxu1 %v3955_v25  ;;  %v854_v25 = vld [vmem:[#allocation4 + $0x90] sm:$0xff]  ;;  %v1072_v2 = vld [vmem:[#allocation4 + $0x228] sm:$0xff]  ;;  %v1071_v5 = vld [vmem:[#allocation4 + $0x220] sm:$0xff] }
 0x109   : > { %v1165_v8 = vld [vmem:[#allocation4 + $0x258] sm:$0xff]  ;;  %v1162_v12 = vld [vmem:[#allocation4 + $0x240] sm:$0xff]  ;;  %v1176_v35 = vld [vmem:[#allocation4 + $0x2b0] sm:$0xff] }
 0x10a   : > { %3605 = vmatmul.mubr.msk.f32.gmra.mrb[4].mxu1 %vm690_vm0, %v685_v30  ;;  %v3989_v30 = vpack.c.bf16 %v854_v25, %v852_v24  ;;  %v1169_v16 = vld [vmem:[#allocation4 + $0x278] sm:$0xff]  ;;  %v1166_v20 = vld [vmem:[#allocation4 + $0x260] sm:$0xff]  ;;  %v1184_v46 = vld [vmem:[#allocation4 + $0x2f0] sm:$0xff] }
 0x10b   : > { %3607 = vmatprep.mubr.msk.f32.mxu1 %vm690_vm0, %v686_v32  ;;  %3958 = vmatpush1.bf16.msra.mxu1 %v3957_v31  ;;  %v3991_v31 = vpack.c.bf16 %v859_v28, %v857_v27  ;;  %v856_v32 = vld [vmem:[#allocation4 + $0xa0] sm:$0xff]  ;;  %v1173_v24 = vld [vmem:[#allocation4 + $0x298] sm:$0xff]  ;;  %v1274_v47 = vld [vmem:[#allocation4 + $0x308] sm:$0xff] }
 0x10c   : > { %3960 = vmatprep.subr.bf16.mxu1 %v3959_v33  ;;  %v858_v33 = vld [vmem:[#allocation4 + $0xb0] sm:$0xff]  ;;  %v1170_v28 = vld [vmem:[#allocation4 + $0x280] sm:$0xff]  ;;  %v1278_v53 = vld [vmem:[#allocation4 + $0x328] sm:$0xff] }
 0x10d   : > { %v3993_v36 = vpack.c.bf16 %v858_v33, %v856_v32  ;;  %v1177_v32 = vld [vmem:[#allocation4 + $0x2b8] sm:$0xff]  ;;  %v1275_v52 = vld [vmem:[#allocation4 + $0x310] sm:$0xff]  ;;  %vm1418_vm4 = vmor %vm1417_vm3, %vm1416_vm2 }
 0x10e   : > { %3608 = vmatmul.mubr.msk.f32.gmra.mrb[6].mxu1 %vm690_vm0, %v687_v38  ;;  %v1051_v38 = vld [vmem:[#allocation4 + $0x180] sm:$0xff] }
 0x10f   : > { %3610 = vmatprep.mubr.msk.f32.mxu1 %vm690_vm0, %v688_v40  ;;  %3962 = vmatpush1.bf16.msra.mxu1 %v3961_v39  ;;  %v1053_v39 = vld [vmem:[#allocation4 + $0x190] sm:$0xff]  ;;  %v1056_v40 = vld [vmem:[#allocation4 + $0x1a8] sm:$0xff] }
 0x110   : > { %3964 = vmatprep.subr.bf16.mxu1 %v3963_v41  ;;  %v1058_v41 = vld [vmem:[#allocation4 + $0x1b8] sm:$0xff]  ;;  %v3997_v42 = vpack.c.bf16 %v1053_v39, %v1051_v38 }
 0x111   : > { %v3999_v43 = vpack.c.bf16 %v1058_v41, %v1056_v40  ;;  %v1178_v40 = vld [vmem:[#allocation4 + $0x2c0] sm:$0xff]  ;;  %v1180_v41 = vld [vmem:[#allocation4 + $0x2d0] sm:$0xff] }
 0x112   : > { %3611 = vmatmul.mubr.msk.f32.gmra.mrb[8].mxu1 %vm690_vm0, %v689_v44  ;;  %v1055_v44 = vld [vmem:[#allocation4 + $0x1a0] sm:$0xff] }
 0x113   : > { %3966 = vmatpush1.bf16.msra.mxu1 %v3965_v45  ;;  %955 = vmatprep.mubr.f32.mxu1 %v4876_v55  ;;  %v1057_v45 = vld [vmem:[#allocation4 + $0x1b0] sm:$0xff] }
 0x114   : > { %3968 = vmatprep.subr.bf16.mxu1 %v3967_v48  ;;  %v4001_v48 = vpack.c.bf16 %v1057_v45, %v1055_v44  ;;  %v1182_v45 = vld [vmem:[#allocation4 + $0x2e0] sm:$0xff] }
 0x117   : > { %3970 = vmatpush1.bf16.msra.mxu1 %v3969_v51  ;;  %v1061_v51 = vld [vmem:[#allocation4 + $0x1d0] sm:$0xff] }
 0x118   : > { %3972 = vmatprep.subr.bf16.mxu1 %v3971_v54  ;;  %v4005_v54 = vpack.c.bf16 %v1061_v51, %v1059_v50  ;;  %v1273_v51 = vld [vmem:[#allocation4 + $0x300] sm:$0xff] }
 0x1d5   : > { %v5256_v56 = vpop.f32.mrb[0].mxu1 }
 0x1d6   : > { %v5258_v59 = vpop.f32.mrb[1].mxu1 }
 0x1d9   : > { %v3603_v63 = vpop.f32.mrb[2].mxu1 }
 0x1da   : > { %v797_v3 = vpop.f32.mrb[3].mxu1 }
 0x1db   : > { %3377 = vmatmul.mubr.msk.f32.vlgmr.msra.gmra.mrb[10].mxu1 %vm884_vm1, %v797_v3  ;;  %v1074_v3 = vld [vmem:[#allocation4 + $0x238] sm:$0xff] }
 0x1dc   : > { %3974 = vmatpush1.bf16.msra.mxu1 %v3973_v62  ;;  %961 = vmatprep.mubr.f32.mxu1 %v4876_v55  ;;  %v4015_v4 = vpack.c.bf16 %v1074_v3, %v1072_v2  ;;  %v1283_v2 = vld [vmem:[#allocation4 + $0x350] sm:$0xff]  ;;  %v1286_v3 = vld [vmem:[#allocation4 + $0x368] sm:$0xff] }
 0x1dd   : > { %3976 = vmatprep.subr.bf16.mxu1 %v3975_v0  ;;  %v5262_v10 = vpop.f32.mrb[4].mxu1  ;;  %v1067_v0 = vld [vmem:[#allocation4 + $0x200] sm:$0xff] }
 0x1de   : > { %v5264_v13 = vpop.f32.mrb[5].mxu1 }
 0x1df   : > { %3378 = vmatmul.mubr.msk.f32.gmra.mrb[12].mxu1 %vm884_vm1, %v3603_v63  ;;  %v4011_v63 = vpack.c.bf16 %v1070_v61, %v1068_v60  ;;  %v1279_v60 = vld [vmem:[#allocation4 + $0x330] sm:$0xff]  ;;  %v1282_v61 = vld [vmem:[#allocation4 + $0x348] sm:$0xff] }
 0x1e0   : > { %3978 = vmatpush1.bf16.msra.mxu1 %v3977_v6  ;;  %1038 = vmatprep.mubr.f32.mxu1 %v4876_v55  ;;  %v1073_v6 = vld [vmem:[#allocation4 + $0x230] sm:$0xff] }
 0x1e1   : > { %3980 = vmatprep.subr.bf16.mxu1 %v3979_v7  ;;  %v5268_v18 = vpop.f32.mrb[6].mxu1  ;;  %v1163_v7 = vld [vmem:[#allocation4 + $0x248] sm:$0xff]  ;;  %v4017_v9 = vpack.c.bf16 %v1073_v6, %v1071_v5  ;;  %v1287_v6 = vld [vmem:[#allocation4 + $0x370] sm:$0xff] }
 0x1e2   : > { %v5270_v21 = vpop.f32.mrb[7].mxu1  ;;  %v4019_v11 = vpack.c.bf16 %v1165_v8, %v1163_v7  ;;  %v1290_v7 = vld [vmem:[#allocation4 + $0x388] sm:$0xff]  ;;  %v1292_v8 = vld [vmem:[#allocation4 + $0x398] sm:$0xff] }
 0x1e4   : > { %3982 = vmatpush1.bf16.msra.mxu1 %v3981_v14  ;;  %v1164_v14 = vld [vmem:[#allocation4 + $0x250] sm:$0xff] }
 0x1e5   : > { %3984 = vmatprep.subr.bf16.mxu1 %v3983_v15  ;;  %v5272_v26 = vpop.f32.mrb[8].mxu1  ;;  %v1167_v15 = vld [vmem:[#allocation4 + $0x268] sm:$0xff]  ;;  %v4021_v17 = vpack.c.bf16 %v1164_v14, %v1162_v12  ;;  %v1289_v12 = vld [vmem:[#allocation4 + $0x380] sm:$0xff]  ;;  %v1291_v14 = vld [vmem:[#allocation4 + $0x390] sm:$0xff] }
 0x1e6   : > { %v5274_v29 = vpop.f32.mrb[9].mxu1  ;;  %v4023_v19 = vpack.c.bf16 %v1169_v16, %v1167_v15  ;;  %v1294_v15 = vld [vmem:[#allocation4 + $0x3a8] sm:$0xff]  ;;  %v1296_v16 = vld [vmem:[#allocation4 + $0x3b8] sm:$0xff] }
 0x1e8   : > { %3986 = vmatpush1.bf16.msra.mxu1 %v3985_v22  ;;  %v1168_v22 = vld [vmem:[#allocation4 + $0x270] sm:$0xff] }
 0x1e9   : > { %3988 = vmatprep.subr.bf16.mxu1 %v3987_v23  ;;  %v1171_v23 = vld [vmem:[#allocation4 + $0x288] sm:$0xff]  ;;  %v4025_v25 = vpack.c.bf16 %v1168_v22, %v1166_v20  ;;  %v1295_v20 = vld [vmem:[#allocation4 + $0x3b0] sm:$0xff] }
 0x1ea   : > { %v4027_v27 = vpack.c.bf16 %v1173_v24, %v1171_v23  ;;  %v4877_v23 = vmov 0.0|0.0   ;;  %v1386_v24 = vlaneseq }
 0x1ec   : > { %3990 = vmatpush1.bf16.msra.mxu1 %v3989_v30  ;;  %v1172_v30 = vld [vmem:[#allocation4 + $0x290] sm:$0xff] }
 0x1ed   : > { %3992 = vmatprep.subr.bf16.mxu1 %v3991_v31  ;;  %v1175_v31 = vld [vmem:[#allocation4 + $0x2a8] sm:$0xff]  ;;  %v4029_v33 = vpack.c.bf16 %v1172_v30, %v1170_v28  ;;  %v1384_v28 = vld [vmem:[#allocation6] sm:$0x3] }
 0x1ee   : > { %v4031_v34 = vpack.c.bf16 %v1177_v32, %v1175_v31 }
 0x1f0   : > { %3994 = vmatpush1.bf16.msra.mxu1 %v3993_v36  ;;  %v1179_v36 = vld [vmem:[#allocation4 + $0x2c8] sm:$0xff] }
 0x1f1   : > { %3996 = vmatprep.subr.bf16.mxu1 %v3995_v37  ;;  %v1181_v37 = vld [vmem:[#allocation4 + $0x2d8] sm:$0xff] }
 0x1f2   : > { %v4035_v39 = vpack.c.bf16 %v1181_v37, %v1179_v36 }
 0x1f3   : > { %3379 = vmatmul.mubr.msk.f32.vlgmr.msra.gmra.mrb[10].mxu1 %vm884_vm1, %v5258_v59  ;;  %v1065_v59 = vld [vmem:[#allocation4 + $0x1f0] sm:$0xff] }
 0x1f4   : > { %3998 = vmatpush1.bf16.msra.mxu1 %v3997_v42  ;;  %1044 = vmatprep.mubr.f32.mxu1 %v4876_v55  ;;  %v4009_v62 = vpack.c.bf16 %v1065_v59, %v1063_v58  ;;  %v1183_v42 = vld [vmem:[#allocation4 + $0x2e8] sm:$0xff]  ;;  %v1277_v59 = vld [vmem:[#allocation4 + $0x320] sm:$0xff] }
 0x1f5   : > { %4000 = vmatprep.subr.bf16.mxu1 %v3999_v43  ;;  %v1185_v43 = vld [vmem:[#allocation4 + $0x2f8] sm:$0xff] }
 0x1f6   : > { %v4039_v44 = vpack.c.bf16 %v1185_v43, %v1183_v42 }
 0x1f7   : > { %3380 = vmatmul.mubr.msk.f32.gmra.mrb[12].mxu1 %vm884_vm1, %v5256_v56  ;;  %v4013_v56 = vpack.c.bf16 %v1069_v1, %v1067_v0  ;;  %v1281_v1 = vld [vmem:[#allocation4 + $0x340] sm:$0xff] }
 0x1f8   : > { %4002 = vmatpush1.bf16.msra.mxu1 %v4001_v48  ;;  %1145 = vmatprep.mubr.f32.mxu1 %v4876_v55  ;;  %v1276_v48 = vld [vmem:[#allocation4 + $0x318] sm:$0xff] }
 0x1f9   : > { %4004 = vmatprep.subr.bf16.mxu1 %v4003_v49  ;;  %v4041_v49 = vpack.c.bf16 %v1184_v46, %v1182_v45  ;;  %v4043_v50 = vpack.c.bf16 %v1276_v48, %v1274_v47  ;;  %v1561_v45 = vld [vmem:[#allocation7 + $0xc0] sm:$0xff]  ;;  %v1562_v46 = vld [vmem:[#allocation7 + $0xc8] sm:$0xff] }
 0x1fa   : > { %v1421_v47 = vld [vmem:[%s5796_s4] sm:$0xff]  ;;  %v4072_v48 = vpack.c.bf16 %v1562_v46, %v1561_v45  ;;  %v1747_v46 = vld [vmem:[#allocation7 + $0x1f8] sm:$0xff] }
 0x1fb   : > { %v1746_v45 = vld [vmem:[#allocation7 + $0x1f0] sm:$0xff] }
 0x1fc   : > { %4006 = vmatpush1.bf16.msra.mxu1 %v4005_v54  ;;  %v1280_v54 = vld [vmem:[#allocation4 + $0x338] sm:$0xff] }
 0x1fd   : > { %4008 = vmatprep.subr.bf16.mxu1 %v4007_v57  ;;  %v4045_v57 = vpack.c.bf16 %v1275_v52, %v1273_v51  ;;  %v4047_v58 = vpack.c.bf16 %v1280_v54, %v1278_v53  ;;  %v1422_v51 = vld [vmem:[%s5796_s4 + $0x8] sm:$0xff]  ;;  %v1565_v53 = vld [vmem:[#allocation7 + $0xe0] sm:$0xff]  ;;  %v1566_v54 = vld [vmem:[#allocation7 + $0xe8] sm:$0xff] }
 0x200   : > { %4010 = vmatpush1.bf16.msra.mxu1 %v4009_v62  ;;  %v1284_v62 = vld [vmem:[#allocation4 + $0x358] sm:$0xff] }
 0x201   : > { %4012 = vmatprep.subr.bf16.mxu1 %v4011_v63  ;;  %v4049_v63 = vpack.c.bf16 %v1279_v60, %v1277_v59  ;;  %v4051_v0 = vpack.c.bf16 %v1284_v62, %v1282_v61  ;;  %v1567_v59 = vld [vmem:[#allocation7 + $0xf0] sm:$0xff]  ;;  %v1568_v60 = vld [vmem:[#allocation7 + $0xf8] sm:$0xff]  ;;  %v1424_v61 = vld [vmem:[%s5796_s4 + $0x18] sm:$0xff] }
 0x202   : > { %v4081_v62 = vpack.c.bf16 %v1568_v60, %v1567_v59  ;;  %v1754_v59 = vld [vmem:[#allocation7 + $0x230] sm:$0xff]  ;;  %v1755_v60 = vld [vmem:[#allocation7 + $0x238] sm:$0xff] }
 0x204   : > { %4014 = vmatpush1.bf16.msra.mxu1 %v4013_v56  ;;  %v1288_v56 = vld [vmem:[#allocation4 + $0x378] sm:$0xff] }
 0x205   : > { %4016 = vmatprep.subr.bf16.mxu1 %v4015_v4  ;;  %v4053_v4 = vpack.c.bf16 %v1283_v2, %v1281_v1  ;;  %v4055_v5 = vpack.c.bf16 %v1288_v56, %v1286_v3  ;;  %v1425_v1 = vld [vmem:[%s5796_s4 + $0x20] sm:$0xff]  ;;  %v1572_v56 = vld [vmem:[#allocation7 + $0x118] sm:$0xff] }
 0x206   : > { %v1571_v3 = vld [vmem:[#allocation7 + $0x110] sm:$0xff] }
 0x208   : > { %4018 = vmatpush1.bf16.msra.mxu1 %v4017_v9 }
 0x209   : > { %4020 = vmatprep.subr.bf16.mxu1 %v4019_v11  ;;  %v4059_v11 = vpack.c.bf16 %v1292_v8, %v1290_v7  ;;  %v1575_v7 = vld [vmem:[#allocation7 + $0x130] sm:$0xff]  ;;  %v1576_v8 = vld [vmem:[#allocation7 + $0x138] sm:$0xff] }
 0x20b   : > { %3381 = vmatmul.mubr.msk.f32.vlgmr.msra.gmra.mrb[10].mxu1 %vm884_vm1, %v5264_v13  ;;  %v1174_v13 = vld [vmem:[#allocation4 + $0x2a0] sm:$0xff] }
 0x20c   : > { %4022 = vmatpush1.bf16.msra.mxu1 %v4021_v17  ;;  %1151 = vmatprep.mubr.f32.mxu1 %v4876_v55  ;;  %v4033_v38 = vpack.c.bf16 %v1176_v35, %v1174_v13  ;;  %v4063_v17 = vpack.c.bf16 %v1296_v16, %v1294_v15  ;;  %v1579_v15 = vld [vmem:[#allocation7 + $0x150] sm:$0xff]  ;;  %v1580_v16 = vld [vmem:[#allocation7 + $0x158] sm:$0xff] }
 0x20d   : > { %4024 = vmatprep.subr.bf16.mxu1 %v4023_v19  ;;  %v1293_v19 = vld [vmem:[#allocation4 + $0x3a0] sm:$0xff] }
 0x20e   : > { %v4065_v22 = vpack.c.bf16 %v1295_v20, %v1293_v19  ;;  %v1582_v19 = vld [vmem:[#allocation7 + $0x168] sm:$0xff] }
 0x20f   : > { %3382 = vmatmul.mubr.msk.f32.gmra.mrb[12].mxu1 %vm884_vm1, %v5262_v10  ;;  %v4037_v10 = vpack.c.bf16 %v1180_v41, %v1178_v40 }
 0x210   : > { %4026 = vmatpush1.bf16.msra.mxu1 %v4025_v25  ;;  %1256 = vmatprep.mubr.f32.mxu1 %v4876_v55  ;;  %v1387_v25 = vshrl.u32 %v1386_v24, 7  ;;  %v1584_v24 = vld [vmem:[#allocation7 + $0x178] sm:$0xff] }
 0x211   : > { %4028 = vmatprep.subr.bf16.mxu1 %v4027_v27 }
 0x212   : > { %v1388_v27 = vsub.s32 0, %v1387_v25  ;;  %v1392_v30 = vsub.s32 1, %v1387_v25 }
 0x214   : > { %4030 = vmatpush1.bf16.msra.mxu1 %v4029_v33  ;;  %v1389_v31 = vrot.slane %v1384_v28, %v1388_v27  ;;  %v1393_v32 = vrot.slane %v1384_v28, %v1392_v30  ;;  %v1732_v27 = vld [vmem:[#allocation7 + $0x180] sm:$0xff]  ;;  %v1733_v28 = vld [vmem:[#allocation7 + $0x188] sm:$0xff] }
 0x215   : > { %4032 = vmatprep.subr.bf16.mxu1 %v4031_v34  ;;  %v4144_v30 = vpack.c.bf16 %v1733_v28, %v1732_v27 }
 0x218   : > { %4034 = vmatpush1.bf16.msra.mxu1 %v4033_v38 }
 0x219   : > { %4036 = vmatprep.subr.bf16.mxu1 %v4035_v39 }
 0x21c   : > { %4038 = vmatpush1.bf16.msra.mxu1 %v4037_v10 }
 0x21d   : > { %4040 = vmatprep.subr.bf16.mxu1 %v4039_v44 }
 0x220   : > { %4042 = vmatpush1.bf16.msra.mxu1 %v4041_v49  ;;  %v1563_v49 = vld [vmem:[#allocation7 + $0xd0] sm:$0xff] }
 0x221   : > { %4044 = vmatprep.subr.bf16.mxu1 %v4043_v50  ;;  %v1564_v50 = vld [vmem:[#allocation7 + $0xd8] sm:$0xff] }
 0x222   : > { %v4075_v52 = vpack.c.bf16 %v1564_v50, %v1563_v49  ;;  %v1749_v49 = vld [vmem:[#allocation7 + $0x208] sm:$0xff] }
 0x223   : > { %3383 = vmatmul.mubr.msk.f32.vlgmr.msra.gmra.mrb[10].mxu1 %vm884_vm1, %v5270_v21  ;;  %v1285_v21 = vld [vmem:[#allocation4 + $0x360] sm:$0xff] }
 0x224   : > { %4046 = vmatpush1.bf16.msra.mxu1 %v4045_v57  ;;  %1262 = vmatprep.mubr.f32.mxu1 %v4876_v55  ;;  %v4057_v9 = vpack.c.bf16 %v1287_v6, %v1285_v21  ;;  %v1423_v57 = vld [vmem:[%s5796_s4 + $0x10] sm:$0xff]  ;;  %v1574_v21 = vld [vmem:[#allocation7 + $0x128] sm:$0xff] }
 0x225   : > { %4048 = vmatprep.subr.bf16.mxu1 %v4047_v58  ;;  %v4078_v58 = vpack.c.bf16 %v1566_v54, %v1565_v53  ;;  %v1752_v54 = vld [vmem:[#allocation7 + $0x220] sm:$0xff] }
 0x227   : > { %3384 = vmatmul.mubr.msk.f32.gmra.mrb[12].mxu1 %vm884_vm1, %v5268_v18  ;;  %v4061_v18 = vpack.c.bf16 %v1291_v14, %v1289_v12  ;;  %v1578_v12 = vld [vmem:[#allocation7 + $0x148] sm:$0xff] }
 0x228   : > { %4050 = vmatpush1.bf16.msra.mxu1 %v4049_v63  ;;  %1367 = vmatprep.mubr.f32.mxu1 %v4876_v55  ;;  %v1569_v63 = vld [vmem:[#allocation7 + $0x100] sm:$0xff] }
 0x229   : > { %4052 = vmatprep.subr.bf16.mxu1 %v4051_v0  ;;  %v1570_v0 = vld [vmem:[#allocation7 + $0x108] sm:$0xff] }
 0x22a   : > { %v4084_v2 = vpack.c.bf16 %v1570_v0, %v1569_v63  ;;  %v1537_v0 = vld [vmem:[#allocation7] sm:$0xff] }
 0x22c   : > { %4054 = vmatpush1.bf16.msra.mxu1 %v4053_v4  ;;  %v4087_v4 = vpack.c.bf16 %v1572_v56, %v1571_v3  ;;  %v1539_v56 = vld [vmem:[#allocation7 + $0x10] sm:$0xff] }
 0x22d   : > { %4056 = vmatprep.subr.bf16.mxu1 %v4055_v5  ;;  %v1573_v5 = vld [vmem:[#allocation7 + $0x120] sm:$0xff] }
 0x22e   : > { %v4090_v6 = vpack.c.bf16 %v1574_v21, %v1573_v5  ;;  %v1540_v5 = vld [vmem:[#allocation7 + $0x18] sm:$0xff]  ;;  %v1928_v21 = vld [vmem:[#allocation7 + $0x300] sm:$0xff] }
 0x230   : > { %4058 = vmatpush1.bf16.msra.mxu1 %v4057_v9  ;;  %v4093_v9 = vpack.c.bf16 %v1576_v8, %v1575_v7  ;;  %v4111_v7 = vpack.c.bf16 %v1540_v5, %v1539_v56  ;;  %v1541_v8 = vld [vmem:[#allocation7 + $0x20] sm:$0xff]  ;;  %v1946_v5 = vld [vmem:[#allocation7 + $0x390] sm:$0xff] }
 0x231   : > { %4060 = vmatprep.subr.bf16.mxu1 %v4059_v11  ;;  %v1577_v11 = vld [vmem:[#allocation7 + $0x140] sm:$0xff] }
 0x232   : > { %v4096_v14 = vpack.c.bf16 %v1578_v12, %v1577_v11  ;;  %v1542_v12 = vld [vmem:[#allocation7 + $0x28] sm:$0xff] }
 0x234   : > { %4062 = vmatpush1.bf16.msra.mxu1 %v4061_v18  ;;  %v4099_v18 = vpack.c.bf16 %v1580_v16, %v1579_v15  ;;  %v1930_v15 = vld [vmem:[#allocation7 + $0x310] sm:$0xff]  ;;  %v1931_v16 = vld [vmem:[#allocation7 + $0x318] sm:$0xff] }
 0x235   : > { %4064 = vmatprep.subr.bf16.mxu1 %v4063_v17  ;;  %v1581_v17 = vld [vmem:[#allocation7 + $0x160] sm:$0xff] }
 0x236   : > { %v4102_v20 = vpack.c.bf16 %v1582_v19, %v1581_v17  ;;  %v1543_v17 = vld [vmem:[#allocation7 + $0x30] sm:$0xff]  ;;  %v4219_v19 = vpack.c.bf16 %v1931_v16, %v1930_v15  ;;  %v1830_v16 = vld [vmem:[#allocation7 + $0x240] sm:$0xff] }
 0x238   : > { %4066 = vmatpush1.bf16.msra.mxu1 %v4065_v22  ;;  %v1583_v22 = vld [vmem:[#allocation7 + $0x170] sm:$0xff] }
 0x239   : > { %4143 = vmatprep.subr.bf16.mxu1 %v4877_v23  ;;  %v4105_v25 = vpack.c.bf16 %v1584_v24, %v1583_v22  ;;  %v1544_v22 = vld [vmem:[#allocation7 + $0x38] sm:$0xff]  ;;  %v1932_v24 = vld [vmem:[#allocation7 + $0x320] sm:$0xff] }
 0x23a   : > { %v4117_v28 = vpack.c.bf16 %v1544_v22, %v1543_v17  ;;  %v1950_v17 = vld [vmem:[#allocation7 + $0x3b0] sm:$0xff] }
 0x23b   : > { %3385 = vmatmul.mubr.msk.f32.vlgmr.msra.gmra.mrb[10].mxu1 %vm884_vm1, %v5274_v29 }
 0x23c   : > { %1373 = vmatprep.mubr.f32.mxu1 %v4876_v55  ;;  %4145 = vmatpush1.bf16.msra.mxu1 %v4144_v30  ;;  %v1545_v30 = vld [vmem:[#allocation7 + $0x40] sm:$0xff] }
 0x23d   : > { %4146 = vmatprep.subr.bf16.mxu1 %v4877_v23 }
 0x23f   : > { %3386 = vmatmul.mubr.msk.f32.gmra.mrb[12].mxu1 %vm884_vm1, %v5272_v26 }
 0x30e   : > { %v1369_v33 = vpop.f32.mrb[10].mxu1 }
 0x30f   : > { %v1396_v34 = vadd.f32 %v1389_v31, %v1369_v33  ;;  %v1371_v13 = vpop.f32.mrb[11].mxu1 }
 0x310   : > { %v1397_v29 = vadd.f32 %v1393_v32, %v1371_v13  ;;  %v1737_v13 = vld [vmem:[#allocation7 + $0x1a8] sm:$0xff] }
 0x311   : > { %v1400_v35 = vmax.f32 %v1396_v34, 0.0  ;;  %v1736_v34 = vld [vmem:[#allocation7 + $0x1a0] sm:$0xff] }
 0x312   : > { %v1401_v36 = vmax.f32 %v1397_v29, 0.0  ;;  %v1375_v26 = vpop.f32.mrb[12].mxu1  ;;  %v4150_v29 = vpack.c.bf16 %v1737_v13, %v1736_v34  ;;  %v1934_v34 = vld [vmem:[#allocation7 + $0x330] sm:$0xff]  ;;  %v1935_v13 = vld [vmem:[#allocation7 + $0x338] sm:$0xff] }
 0x313   : > { %v1398_v37 = vadd.f32 %v1389_v31, %v1375_v26  ;;  %v1377_v38 = vpop.f32.mrb[13].mxu1  ;;  %v1734_v31 = vld [vmem:[#allocation7 + $0x190] sm:$0xff] }
 0x314   : > { %v3417_v39 = vpack.c.bf16 %v1401_v36, %v1400_v35  ;;  %v1399_v40 = vadd.f32 %v1393_v32, %v1377_v38  ;;  %v1735_v32 = vld [vmem:[#allocation7 + $0x198] sm:$0xff]  ;;  %v1741_v38 = vld [vmem:[#allocation7 + $0x1c8] sm:$0xff] }
 0x315   : > { %v1402_v41 = vmax.f32 %v1398_v37, 0.0  ;;  %v4147_v33 = vpack.c.bf16 %v1735_v32, %v1734_v31  ;;  %v1740_v37 = vld [vmem:[#allocation7 + $0x1c0] sm:$0xff] }
 0x316   : > { %v1403_v42 = vmax.f32 %v1399_v40, 0.0  ;;  %1419 = vst.msk [vmem:[%s664_s21] sm:$0xff] %vm1418_vm4, %v3417_v39  ;;  %v4156_v39 = vpack.c.bf16 %v1741_v38, %v1740_v37  ;;  %v1742_v40 = vld [vmem:[#allocation7 + $0x1d0] sm:$0xff]  ;;  %v1548_v37 = vld [vmem:[#allocation7 + $0x58] sm:$0xff]  ;;  %v1936_v38 = vld [vmem:[#allocation7 + $0x340] sm:$0xff] }
 0x317   : > { %v4069_v43 = vpack.c.bf16 %v1402_v41, %v1400_v35  ;;  %4148 = vmatpush1.bf16.msra.mxu1 %v4147_v33  ;;  %v1738_v35 = vld [vmem:[#allocation7 + $0x1b0] sm:$0xff]  ;;  %v1546_v33 = vld [vmem:[#allocation7 + $0x48] sm:$0xff] }
 0x318   : > { %v3418_v10 = vpack.c.bf16 %v1403_v42, %v1402_v41  ;;  %v4067_v44 = vpack.c.bf16 %v1403_v42, %v1401_v36  ;;  %4149 = vmatprep.subr.bf16.mxu1 %v4877_v23  ;;  %v1739_v36 = vld [vmem:[#allocation7 + $0x1b8] sm:$0xff] }
 0x319   : > { %v4153_v26 = vpack.c.bf16 %v1739_v36, %v1738_v35  ;;  %v1743_v41 = vld [vmem:[#allocation7 + $0x1d8] sm:$0xff]  ;;  %v4120_v35 = vpack.c.bf16 %v1546_v33, %v1545_v30  ;;  %v1547_v36 = vld [vmem:[#allocation7 + $0x50] sm:$0xff]  ;;  %v1835_v33 = vld [vmem:[#allocation7 + $0x268] sm:$0xff] }
 0x31a   : > { %4068 = vmatprep.subr.bf16.mxu0 %v4067_v44  ;;  %1420 = vst.msk [vmem:[%s664_s21 + $0x8] sm:$0xff] %vm1418_vm4, %v3418_v10  ;;  %v4159_v42 = vpack.c.bf16 %v1743_v41, %v1742_v40  ;;  %v1745_v10 = vld [vmem:[#allocation7 + $0x1e8] sm:$0xff]  ;;  %v4123_v40 = vpack.c.bf16 %v1548_v37, %v1547_v36  ;;  %v1549_v41 = vld [vmem:[#allocation7 + $0x60] sm:$0xff]  ;;  %v1841_v37 = vld [vmem:[#allocation7 + $0x298] sm:$0xff]  ;;  %s3365_s21 = sshll.u32 %s5837_s24, 2 }
 0x31b   : > { %4070 = vmatpush1.bf16.msra.mxu0 %v4069_v43  ;;  %4151 = vmatpush1.bf16.msra.mxu1 %v4150_v29  ;;  %v1744_v43 = vld [vmem:[#allocation7 + $0x1e0] sm:$0xff]  ;;  %s668_s0 = scalar_lea.vmem %s5832_s17, %s3365_s21 }
 0x31c   : > { %4071 = vmatprep.subr.bf16.mxu0 %v4877_v23  ;;  %4152 = vmatprep.subr.bf16.mxu1 %v4877_v23  ;;  %v4162_v44 = vpack.c.bf16 %v1745_v10, %v1744_v43  ;;  %v1550_v43 = vld [vmem:[#allocation7 + $0x68] sm:$0xff]  ;;  %v1938_v10 = vld [vmem:[#allocation7 + $0x350] sm:$0xff] }
 0x31e   : > { %3389 = vmatmul.mubr.msk.f32.vlgmr.msra.gmra.mrb[0].mxu0 %vm1426_vm5, %v1421_v47  ;;  %v4165_v47 = vpack.c.bf16 %v1747_v46, %v1746_v45  ;;  %v4126_v45 = vpack.c.bf16 %v1550_v43, %v1549_v41  ;;  %v1551_v46 = vld [vmem:[#allocation7 + $0x70] sm:$0xff] }
 0x31f   : > { %1512 = vmatprep.mubr.f32.mxu0 %v4876_v55  ;;  %4073 = vmatpush1.bf16.msra.mxu0 %v4072_v48  ;;  %v1748_v48 = vld [vmem:[#allocation7 + $0x200] sm:$0xff]  ;;  %v1844_v41 = vld [vmem:[#allocation7 + $0x2b0] sm:$0xff] }
 0x320   : > { %4074 = vmatprep.subr.bf16.mxu0 %v4877_v23  ;;  %4154 = vmatpush1.bf16.msra.mxu1 %v4153_v26  ;;  %v4168_v50 = vpack.c.bf16 %v1749_v49, %v1748_v48  ;;  %v4225_v26 = vpack.c.bf16 %v1935_v13, %v1934_v34  ;;  %v1552_v48 = vld [vmem:[#allocation7 + $0x78] sm:$0xff]  ;;  %v1940_v49 = vld [vmem:[#allocation7 + $0x360] sm:$0xff]  ;;  %v1836_v13 = vld [vmem:[#allocation7 + $0x270] sm:$0xff] }
 0x321   : > { %4155 = vmatprep.subr.bf16.mxu1 %v4877_v23 }
 0x322   : > { %3390 = vmatmul.mubr.msk.f32.gmra.mrb[2].mxu0 %vm1426_vm5, %v1422_v51  ;;  %v1750_v51 = vld [vmem:[#allocation7 + $0x210] sm:$0xff] }
 0x323   : > { %1518 = vmatprep.mubr.f32.mxu0 %v4876_v55  ;;  %4076 = vmatpush1.bf16.msra.mxu0 %v4075_v52  ;;  %v1751_v52 = vld [vmem:[#allocation7 + $0x218] sm:$0xff] }
 0x324   : > { %4077 = vmatprep.subr.bf16.mxu0 %v4877_v23  ;;  %4157 = vmatpush1.bf16.msra.mxu1 %v4156_v39  ;;  %v4171_v53 = vpack.c.bf16 %v1751_v52, %v1750_v51  ;;  %v1937_v39 = vld [vmem:[#allocation7 + $0x348] sm:$0xff]  ;;  %v4129_v51 = vpack.c.bf16 %v1552_v48, %v1551_v46  ;;  %v1553_v52 = vld [vmem:[#allocation7 + $0x80] sm:$0xff]  ;;  %v1848_v46 = vld [vmem:[#allocation7 + $0x2d0] sm:$0xff] }
 0x325   : > { %4158 = vmatprep.subr.bf16.mxu1 %v4877_v23 }
 0x326   : > { %3391 = vmatmul.mubr.msk.f32.gmra.mrb[4].mxu0 %vm1426_vm5, %v1423_v57  ;;  %v1753_v57 = vld [vmem:[#allocation7 + $0x228] sm:$0xff] }
 0x327   : > { %1524 = vmatprep.mubr.f32.mxu0 %v4876_v55  ;;  %4079 = vmatpush1.bf16.msra.mxu0 %v4078_v58  ;;  %v4174_v58 = vpack.c.bf16 %v1753_v57, %v1752_v54  ;;  %v1554_v54 = vld [vmem:[#allocation7 + $0x88] sm:$0xff]  ;;  %v1942_v57 = vld [vmem:[#allocation7 + $0x370] sm:$0xff] }
 0x328   : > { %4080 = vmatprep.subr.bf16.mxu0 %v4877_v23  ;;  %4160 = vmatpush1.bf16.msra.mxu1 %v4159_v42  ;;  %v4228_v42 = vpack.c.bf16 %v1937_v39, %v1936_v38  ;;  %v1843_v39 = vld [vmem:[#allocation7 + $0x2a8] sm:$0xff] }
 0x329   : > { %4161 = vmatprep.subr.bf16.mxu1 %v4877_v23 }
 0x32a   : > { %3392 = vmatmul.mubr.msk.f32.gmra.mrb[6].mxu0 %vm1426_vm5, %v1424_v61  ;;  %v4177_v61 = vpack.c.bf16 %v1755_v60, %v1754_v59  ;;  %v4132_v59 = vpack.c.bf16 %v1554_v54, %v1553_v52  ;;  %v1555_v60 = vld [vmem:[#allocation7 + $0x90] sm:$0xff] }
 0x32b   : > { %1530 = vmatprep.mubr.f32.mxu0 %v4876_v55  ;;  %4082 = vmatpush1.bf16.msra.mxu0 %v4081_v62  ;;  %v1852_v52 = vld [vmem:[#allocation7 + $0x2f0] sm:$0xff] }
 0x32c   : > { %4083 = vmatprep.subr.bf16.mxu0 %v4877_v23  ;;  %4163 = vmatpush1.bf16.msra.mxu1 %v4162_v44  ;;  %v1939_v44 = vld [vmem:[#allocation7 + $0x358] sm:$0xff] }
 0x32d   : > { %4164 = vmatprep.subr.bf16.mxu1 %v4877_v23 }
 0x32e   : > { %3393 = vmatmul.mubr.msk.f32.gmra.mrb[8].mxu0 %vm1426_vm5, %v1425_v1  ;;  %v1538_v1 = vld [vmem:[#allocation7 + $0x8] sm:$0xff] }
 0x32f   : > { %4085 = vmatpush1.bf16.msra.mxu0 %v4084_v2  ;;  %v4108_v3 = vpack.c.bf16 %v1538_v1, %v1537_v0  ;;  %v1944_v0 = vld [vmem:[#allocation7 + $0x380] sm:$0xff]  ;;  %v1945_v1 = vld [vmem:[#allocation7 + $0x388] sm:$0xff] }
 0x330   : > { %4086 = vmatprep.subr.bf16.mxu0 %v4877_v23  ;;  %4166 = vmatpush1.bf16.msra.mxu1 %v4165_v47  ;;  %v4231_v47 = vpack.c.bf16 %v1939_v44, %v1938_v10  ;;  %v4240_v56 = vpack.c.bf16 %v1945_v1, %v1944_v0  ;;  %v1846_v10 = vld [vmem:[#allocation7 + $0x2c0] sm:$0xff]  ;;  %v1847_v44 = vld [vmem:[#allocation7 + $0x2c8] sm:$0xff] }
 0x331   : > { %4167 = vmatprep.subr.bf16.mxu1 %v4877_v23 }
 0x333   : > { %4088 = vmatpush1.bf16.msra.mxu0 %v4087_v4 }
 0x334   : > { %4089 = vmatprep.subr.bf16.mxu0 %v4877_v23  ;;  %4169 = vmatpush1.bf16.msra.mxu1 %v4168_v50  ;;  %v1941_v50 = vld [vmem:[#allocation7 + $0x368] sm:$0xff] }
 0x335   : > { %4170 = vmatprep.subr.bf16.mxu1 %v4877_v23 }
 0x337   : > { %4091 = vmatpush1.bf16.msra.mxu0 %v4090_v6  ;;  %v1929_v6 = vld [vmem:[#allocation7 + $0x308] sm:$0xff] }
 0x338   : > { %4092 = vmatprep.subr.bf16.mxu0 %v4877_v23  ;;  %4172 = vmatpush1.bf16.msra.mxu1 %v4171_v53  ;;  %v4216_v11 = vpack.c.bf16 %v1929_v6, %v1928_v21  ;;  %v4234_v53 = vpack.c.bf16 %v1941_v50, %v1940_v49  ;;  %v1947_v21 = vld [vmem:[#allocation7 + $0x398] sm:$0xff]  ;;  %v1850_v49 = vld [vmem:[#allocation7 + $0x2e0] sm:$0xff]  ;;  %v1851_v50 = vld [vmem:[#allocation7 + $0x2e8] sm:$0xff] }
 0x339   : > { %4173 = vmatprep.subr.bf16.mxu1 %v4877_v23 }
 0x33b   : > { %4094 = vmatpush1.bf16.msra.mxu0 %v4093_v9 }
 0x33c   : > { %4095 = vmatprep.subr.bf16.mxu0 %v4877_v23  ;;  %4175 = vmatpush1.bf16.msra.mxu1 %v4174_v58  ;;  %v1943_v58 = vld [vmem:[#allocation7 + $0x378] sm:$0xff] }
 0x33d   : > { %4176 = vmatprep.subr.bf16.mxu1 %v4877_v23 }
 0x33f   : > { %4097 = vmatpush1.bf16.msra.mxu0 %v4096_v14 }
 0x340   : > { %4098 = vmatprep.subr.bf16.mxu0 %v4877_v23  ;;  %4178 = vmatpush1.bf16.msra.mxu1 %v4177_v61  ;;  %v4237_v61 = vpack.c.bf16 %v1943_v58, %v1942_v57 }
 0x341   : > { %4215 = vmatprep.subr.bf16.mxu1 %v4877_v23 }
 0x343   : > { %4100 = vmatpush1.bf16.msra.mxu0 %v4099_v18  ;;  %v4114_v18 = vpack.c.bf16 %v1542_v12, %v1541_v8  ;;  %v4243_v8 = vpack.c.bf16 %v1947_v21, %v1946_v5  ;;  %v1949_v12 = vld [vmem:[#allocation7 + $0x3a8] sm:$0xff] }
 0x344   : > { %4101 = vmatprep.subr.bf16.mxu0 %v4877_v23  ;;  %v3399_v5 = vld [vmem:[%s5798_s6] ss:$0 sm:$0xff] }
 0x347   : > { %4103 = vmatpush1.bf16.msra.mxu0 %v4102_v20 }
 0x348   : > { %4104 = vmatprep.subr.bf16.mxu0 %v4877_v23 }
 0x34b   : > { %4106 = vmatpush1.bf16.msra.mxu0 %v4105_v25  ;;  %v1933_v25 = vld [vmem:[#allocation7 + $0x328] sm:$0xff] }
 0x34c   : > { %4107 = vmatprep.subr.bf16.mxu0 %v4877_v23  ;;  %v4222_v31 = vpack.c.bf16 %v1933_v25, %v1932_v24  ;;  %v1832_v24 = vld [vmem:[#allocation7 + $0x250] sm:$0xff]  ;;  %v1833_v25 = vld [vmem:[#allocation7 + $0x258] sm:$0xff] }
 0x34d   : > { %v4183_v30 = vpack.c.bf16 %v1833_v25, %v1832_v24  ;;  %v2039_v24 = vld [vmem:[#allocation9 + $0x10] sm:$0xf] }
 0x3f1   : > { %v5354_v62 = vpop.f32.mrb[0].mxu0 }
 0x3f2   : > { %v1510_v63 = vpop.f32.mrb[1].mxu0 }
 0x3f5   : > { %v1514_v2 = vpop.f32.mrb[2].mxu0 }
 0x3f6   : > { %v1516_v4 = vpop.f32.mrb[3].mxu0 }
 0x3f7   : > { %3394 = vmatprep.mubr.msk.f32.mxu0 %vm1585_vm6, %v1516_v4  ;;  %v1558_v4 = vld [vmem:[#allocation7 + $0xa8] sm:$0xff] }
 0x3f8   : > { %1654 = vmatmul.mubr.f32.vlgmr.msra.gmra.mrb[10].mxu0 %v1514_v2 }
 0x3f9   : > { %4109 = vmatpush1.bf16.msra.mxu0 %v4108_v3  ;;  %3395 = vmatprep.mubr.msk.f32.mxu0 %vm1585_vm6, %v1510_v63  ;;  %v1520_v9 = vpop.f32.mrb[4].mxu0  ;;  %v1556_v63 = vld [vmem:[#allocation7 + $0x98] sm:$0xff]  ;;  %v1557_v3 = vld [vmem:[#allocation7 + $0xa0] sm:$0xff] }
 0x3fa   : > { %4110 = vmatprep.subr.bf16.mxu0 %v4877_v23  ;;  %v1522_v14 = vpop.f32.mrb[5].mxu0  ;;  %v4135_v2 = vpack.c.bf16 %v1556_v63, %v1555_v60  ;;  %v4138_v6 = vpack.c.bf16 %v1558_v4, %v1557_v3 }
 0x3fb   : > { %3396 = vmatprep.mubr.msk.f32.mxu1 %vm1585_vm6, %v1522_v14 }
 0x3fc   : > { %1824 = vmatmul.mubr.f32.vlgmr.msra.gmra.mrb[14].mxu1 %v1520_v9  ;;  %v1560_v9 = vld [vmem:[#allocation7 + $0xb8] sm:$0xff] }
 0x3fd   : > { %4112 = vmatpush1.bf16.msra.mxu0 %v4111_v7  ;;  %4217 = vmatpush1.bf16.msra.mxu1 %v4216_v11  ;;  %v5360_v20 = vpop.f32.mrb[6].mxu0  ;;  %v1559_v7 = vld [vmem:[#allocation7 + $0xb0] sm:$0xff]  ;;  %v1948_v11 = vld [vmem:[#allocation7 + $0x3a0] sm:$0xff] }
 0x3fe   : > { %4113 = vmatprep.subr.bf16.mxu0 %v4877_v23  ;;  %4218 = vmatprep.subr.bf16.mxu1 %v4877_v23  ;;  %v5364_v27 = vpop.f32.mrb[7].mxu0  ;;  %v4141_v14 = vpack.c.bf16 %v1560_v9, %v1559_v7  ;;  %v4246_v15 = vpack.c.bf16 %v1949_v12, %v1948_v11  ;;  %v2147_v7 = vld [vmem:[%s5800_s8 + $0x88] sm:$0xff]  ;;  %v2037_v11 = vld [vmem:[#allocation9] sm:$0xff] }
 0x401   : > { %4115 = vmatpush1.bf16.msra.mxu0 %v4114_v18  ;;  %4220 = vmatpush1.bf16.msra.mxu1 %v4219_v19  ;;  %v5366_v32 = vpop.f32.mrb[8].mxu0  ;;  %v1831_v18 = vld [vmem:[#allocation7 + $0x248] sm:$0xff]  ;;  %v1951_v19 = vld [vmem:[#allocation7 + $0x3b8] sm:$0xff] }
 0x402   : > { %4116 = vmatprep.subr.bf16.mxu0 %v4877_v23  ;;  %4221 = vmatprep.subr.bf16.mxu1 %v4877_v23  ;;  %v1534_v29 = vpop.f32.mrb[9].mxu0  ;;  %v4180_v22 = vpack.c.bf16 %v1831_v18, %v1830_v16  ;;  %v2038_v18 = vld [vmem:[#allocation9 + $0x8] sm:$0xff] }
 0x403   : > { %3398 = vmatprep.mubr.msk.f32.mxu1 %vm1585_vm6, %v1534_v29 }
 0x405   : > { %4118 = vmatpush1.bf16.msra.mxu0 %v4117_v28  ;;  %4223 = vmatpush1.bf16.msra.mxu1 %v4222_v31  ;;  %v4249_v28 = vpack.c.bf16 %v1951_v19, %v1950_v17  ;;  %v1834_v31 = vld [vmem:[#allocation7 + $0x260] sm:$0xff]  ;;  %v2150_v19 = vld [vmem:[%s5800_s8 + $0xa0] sm:$0xff] }
 0x406   : > { %4119 = vmatprep.subr.bf16.mxu0 %v4877_v23  ;;  %4224 = vmatprep.subr.bf16.mxu1 %v4877_v23  ;;  %v4186_v34 = vpack.c.bf16 %v1835_v33, %v1834_v31  ;;  %v2154_v33 = vld [vmem:[%s5800_s8 + $0xc0] sm:$0xff] }
 0x409   : > { %4121 = vmatpush1.bf16.msra.mxu0 %v4120_v35  ;;  %4226 = vmatpush1.bf16.msra.mxu1 %v4225_v26  ;;  %v1839_v35 = vld [vmem:[#allocation7 + $0x288] sm:$0xff]  ;;  %v1840_v26 = vld [vmem:[#allocation7 + $0x290] sm:$0xff] }
 0x40a   : > { %4122 = vmatprep.subr.bf16.mxu0 %v4877_v23  ;;  %4227 = vmatprep.subr.bf16.mxu1 %v4877_v23  ;;  %v4195_v38 = vpack.c.bf16 %v1841_v37, %v1840_v26  ;;  %v2160_v37 = vld [vmem:[%s5800_s8 + $0xf0] sm:$0xff] }
 0x40d   : > { %4124 = vmatpush1.bf16.msra.mxu0 %v4123_v40  ;;  %4229 = vmatpush1.bf16.msra.mxu1 %v4228_v42  ;;  %v1845_v42 = vld [vmem:[#allocation7 + $0x2b8] sm:$0xff] }
 0x40e   : > { %4125 = vmatprep.subr.bf16.mxu0 %v4877_v23  ;;  %4230 = vmatprep.subr.bf16.mxu1 %v4877_v23  ;;  %v4201_v43 = vpack.c.bf16 %v1845_v42, %v1844_v41  ;;  %v2307_v42 = vld [vmem:[%s5800_s8 + $0x110] sm:$0xff] }
 0x411   : > { %4127 = vmatpush1.bf16.msra.mxu0 %v4126_v45  ;;  %4232 = vmatpush1.bf16.msra.mxu1 %v4231_v47  ;;  %v4204_v45 = vpack.c.bf16 %v1847_v44, %v1846_v10  ;;  %v1849_v47 = vld [vmem:[#allocation7 + $0x2d8] sm:$0xff]  ;;  %v2309_v44 = vld [vmem:[%s5800_s8 + $0x120] sm:$0xff] }
 0x412   : > { %4128 = vmatprep.subr.bf16.mxu0 %v4877_v23  ;;  %4233 = vmatprep.subr.bf16.mxu1 %v4877_v23  ;;  %v4207_v48 = vpack.c.bf16 %v1849_v47, %v1848_v46  ;;  %v2311_v47 = vld [vmem:[%s5800_s8 + $0x130] sm:$0xff] }
 0x415   : > { %4130 = vmatpush1.bf16.msra.mxu0 %v4129_v51  ;;  %4235 = vmatpush1.bf16.msra.mxu1 %v4234_v53  ;;  %v4210_v51 = vpack.c.bf16 %v1851_v50, %v1850_v49  ;;  %v1853_v53 = vld [vmem:[#allocation7 + $0x2f8] sm:$0xff]  ;;  %v2313_v50 = vld [vmem:[%s5800_s8 + $0x140] sm:$0xff] }
 0x416   : > { %4131 = vmatprep.subr.bf16.mxu0 %v4877_v23  ;;  %4236 = vmatprep.subr.bf16.mxu1 %v4877_v23  ;;  %v4213_v54 = vpack.c.bf16 %v1853_v53, %v1852_v52  ;;  %v2315_v53 = vld [vmem:[%s5800_s8 + $0x150] sm:$0xff] }
 0x419   : > { %4133 = vmatpush1.bf16.msra.mxu0 %v4132_v59  ;;  %4238 = vmatpush1.bf16.msra.mxu1 %v4237_v61 }
 0x41a   : > { %4134 = vmatprep.subr.bf16.mxu0 %v4877_v23  ;;  %4239 = vmatprep.subr.bf16.mxu1 %v4877_v23 }
 0x41d   : > { %4136 = vmatpush1.bf16.msra.mxu0 %v4135_v2  ;;  %4241 = vmatpush1.bf16.msra.mxu1 %v4240_v56 }
 0x41e   : > { %4137 = vmatprep.subr.bf16.mxu0 %v4877_v23  ;;  %4242 = vmatprep.subr.bf16.mxu1 %v4877_v23 }
 0x421   : > { %4139 = vmatpush1.bf16.msra.mxu0 %v4138_v6  ;;  %4244 = vmatpush1.bf16.msra.mxu1 %v4243_v8  ;;  %v2146_v6 = vld [vmem:[%s5800_s8 + $0x80] sm:$0xff] }
 0x422   : > { %4140 = vmatprep.subr.bf16.mxu0 %v4877_v23  ;;  %4245 = vmatprep.subr.bf16.mxu1 %v4877_v23  ;;  %v4252_v12 = vpack.c.bf16 %v2147_v7, %v2146_v6  ;;  %v2132_v6 = vld [vmem:[%s5800_s8 + $0x10] sm:$0xff]  ;;  %v2133_v7 = vld [vmem:[%s5800_s8 + $0x18] sm:$0xff] }
 0x425   : > { %4142 = vmatpush1.bf16.msra.mxu0 %v4141_v14  ;;  %4247 = vmatpush1.bf16.msra.mxu1 %v4246_v15  ;;  %v2148_v14 = vld [vmem:[%s5800_s8 + $0x90] sm:$0xff]  ;;  %v2149_v15 = vld [vmem:[%s5800_s8 + $0x98] sm:$0xff] }
 0x426   : > { %4179 = vmatprep.subr.bf16.mxu0 %v4877_v23  ;;  %4248 = vmatprep.subr.bf16.mxu1 %v4877_v23  ;;  %v4255_v17 = vpack.c.bf16 %v2149_v15, %v2148_v14  ;;  %v2134_v15 = vld [vmem:[%s5800_s8 + $0x20] sm:$0xff] }
 0x428   : > { %1727 = vmatmul.mubr.f32.vlgmr.msra.gmra.mrb[12].mxu0 %v5354_v62  ;;  %v1837_v62 = vld [vmem:[#allocation7 + $0x278] sm:$0xff] }
 0x429   : > { %4181 = vmatpush1.bf16.msra.mxu0 %v4180_v22  ;;  %3397 = vmatprep.mubr.msk.f32.mxu0 %vm1585_vm6, %v5364_v27  ;;  %v4189_v29 = vpack.c.bf16 %v1837_v62, %v1836_v13  ;;  %v1838_v27 = vld [vmem:[#allocation7 + $0x280] sm:$0xff]  ;;  %v2151_v22 = vld [vmem:[%s5800_s8 + $0xa8] sm:$0xff] }
 0x42a   : > { %4182 = vmatprep.subr.bf16.mxu0 %v4877_v23  ;;  %4250 = vmatpush1.bf16.msra.mxu1 %v4249_v28  ;;  %v4192_v36 = vpack.c.bf16 %v1839_v35, %v1838_v27  ;;  %v4258_v25 = vpack.c.bf16 %v2151_v22, %v2150_v19  ;;  %v2152_v28 = vld [vmem:[%s5800_s8 + $0xb0] sm:$0xff]  ;;  %v2158_v35 = vld [vmem:[%s5800_s8 + $0xe0] sm:$0xff]  ;;  %v2487_v22 = vld [vmem:[%s5800_s8 + $0x228] sm:$0xff] }
 0x42b   : > { %4299 = vmatprep.subr.bf16.mxu1 %v4877_v23  ;;  %v2156_v62 = vld [vmem:[%s5800_s8 + $0xd0] sm:$0xff]  ;;  %v2486_v19 = vld [vmem:[%s5800_s8 + $0x220] sm:$0xff] }
 0x42d   : > { %4184 = vmatpush1.bf16.msra.mxu0 %v4183_v30  ;;  %2020 = vmatmul.mubr.f32.vlgmr.msra.gmra.mrb[16].mxu1 %v5366_v32  ;;  %v1842_v32 = vld [vmem:[#allocation7 + $0x2a0] sm:$0xff] }
 0x42e   : > { %4185 = vmatprep.subr.bf16.mxu0 %v4877_v23  ;;  %v4198_v40 = vpack.c.bf16 %v1843_v39, %v1842_v32  ;;  %3726 = vmatprep.mubr.msk.f32.mxu1 %vm4878_vm7, %v4876_v55  ;;  %v2153_v30 = vld [vmem:[%s5800_s8 + $0xb8] sm:$0xff]  ;;  %v2305_v39 = vld [vmem:[%s5800_s8 + $0x100] sm:$0xff] }
 0x42f   : > { %v4261_v31 = vpack.c.bf16 %v2153_v30, %v2152_v28  ;;  %v2136_v28 = vld [vmem:[%s5800_s8 + $0x30] sm:$0xff]  ;;  %v2137_v30 = vld [vmem:[%s5800_s8 + $0x38] sm:$0xff] }
 0x431   : > { %4187 = vmatpush1.bf16.msra.mxu0 %v4186_v34  ;;  %v2155_v34 = vld [vmem:[%s5800_s8 + $0xc8] sm:$0xff] }
 0x432   : > { %4188 = vmatprep.subr.bf16.mxu0 %v4877_v23  ;;  %v4264_v13 = vpack.c.bf16 %v2155_v34, %v2154_v33  ;;  %v4354_v33 = vpack.c.bf16 %v2487_v22, %v2486_v19  ;;  %v2488_v34 = vld [vmem:[%s5800_s8 + $0x230] sm:$0xff]  ;;  %v2668_v22 = vld [vmem:[#allocation13] sm:$0xff] }
 0x433   : > { %v2581_v19 = vld [vmem:[#allocation12] sm:$0xff] }
 0x435   : > { %4190 = vmatpush1.bf16.msra.mxu0 %v4189_v29  ;;  %v2157_v29 = vld [vmem:[%s5800_s8 + $0xd8] sm:$0xff] }
 0x436   : > { %4191 = vmatprep.subr.bf16.mxu0 %v4877_v23  ;;  %v4267_v27 = vpack.c.bf16 %v2157_v29, %v2156_v62  ;;  %v4285_v62 = vpack.c.bf16 %v2137_v30, %v2136_v28  ;;  %v2138_v29 = vld [vmem:[%s5800_s8 + $0x40] sm:$0xff]  ;;  %v2670_v28 = vld [vmem:[#allocation13 + $0x10] sm:$0xff]  ;;  %v2671_v30 = vld [vmem:[#allocation13 + $0x18] sm:$0xff] }
 0x439   : > { %4193 = vmatpush1.bf16.msra.mxu0 %v4192_v36  ;;  %v2159_v36 = vld [vmem:[%s5800_s8 + $0xe8] sm:$0xff] }
 0x43a   : > { %4194 = vmatprep.subr.bf16.mxu0 %v4877_v23  ;;  %v4270_v26 = vpack.c.bf16 %v2159_v36, %v2158_v35  ;;  %v2490_v36 = vld [vmem:[%s5800_s8 + $0x240] sm:$0xff] }
 0x43d   : > { %4196 = vmatpush1.bf16.msra.mxu0 %v4195_v38  ;;  %v2161_v38 = vld [vmem:[%s5800_s8 + $0xf8] sm:$0xff] }
 0x43e   : > { %4197 = vmatprep.subr.bf16.mxu0 %v4877_v23  ;;  %v4273_v32 = vpack.c.bf16 %v2161_v38, %v2160_v37  ;;  %v2140_v38 = vld [vmem:[%s5800_s8 + $0x50] sm:$0xff] }
 0x441   : > { %4199 = vmatpush1.bf16.msra.mxu0 %v4198_v40  ;;  %v2306_v40 = vld [vmem:[%s5800_s8 + $0x108] sm:$0xff] }
 0x442   : > { %4200 = vmatprep.subr.bf16.mxu0 %v4877_v23  ;;  %v4300_v41 = vpack.c.bf16 %v2306_v40, %v2305_v39  ;;  %v2492_v40 = vld [vmem:[%s5800_s8 + $0x250] sm:$0xff] }
 0x444   : > { %4301 = vmatpush3.bf16.msra.mxu1 %v4300_v41  ;;  %v2493_v41 = vld [vmem:[%s5800_s8 + $0x258] sm:$0xff] }
 0x445   : > { %4202 = vmatpush1.bf16.msra.mxu0 %v4201_v43  ;;  %4302 = vmatprep.subr.bf16.mxu1 %v4877_v23  ;;  %v2308_v43 = vld [vmem:[%s5800_s8 + $0x118] sm:$0xff] }
 0x446   : > { %4203 = vmatprep.subr.bf16.mxu0 %v4877_v23  ;;  %v4303_v10 = vpack.c.bf16 %v2308_v43, %v2307_v42  ;;  %v2142_v43 = vld [vmem:[%s5800_s8 + $0x60] sm:$0xff] }
 0x448   : > { %4304 = vmatpush3.bf16.msra.mxu1 %v4303_v10  ;;  %v2143_v10 = vld [vmem:[%s5800_s8 + $0x68] sm:$0xff] }
 0x449   : > { %4205 = vmatpush1.bf16.msra.mxu0 %v4204_v45  ;;  %4305 = vmatprep.subr.bf16.mxu1 %v4877_v23  ;;  %v2310_v45 = vld [vmem:[%s5800_s8 + $0x128] sm:$0xff] }
 0x44a   : > { %4206 = vmatprep.subr.bf16.mxu0 %v4877_v23  ;;  %v4306_v46 = vpack.c.bf16 %v2310_v45, %v2309_v44  ;;  %v4363_v44 = vpack.c.bf16 %v2493_v41, %v2492_v40  ;;  %v2494_v45 = vld [vmem:[%s5800_s8 + $0x260] sm:$0xff] }
 0x44c   : > { %4307 = vmatpush3.bf16.msra.mxu1 %v4306_v46  ;;  %v2495_v46 = vld [vmem:[%s5800_s8 + $0x268] sm:$0xff] }
 0x44d   : > { %4208 = vmatpush1.bf16.msra.mxu0 %v4207_v48  ;;  %4308 = vmatprep.subr.bf16.mxu1 %v4877_v23  ;;  %v2312_v48 = vld [vmem:[%s5800_s8 + $0x138] sm:$0xff] }
 0x44e   : > { %4209 = vmatprep.subr.bf16.mxu0 %v4877_v23  ;;  %v4309_v49 = vpack.c.bf16 %v2312_v48, %v2311_v47  ;;  %v4294_v47 = vpack.c.bf16 %v2143_v10, %v2142_v43  ;;  %v2144_v48 = vld [vmem:[%s5800_s8 + $0x70] sm:$0xff] }
 0x450   : > { %4310 = vmatpush3.bf16.msra.mxu1 %v4309_v49  ;;  %v2145_v49 = vld [vmem:[%s5800_s8 + $0x78] sm:$0xff] }
 0x451   : > { %4211 = vmatpush1.bf16.msra.mxu0 %v4210_v51  ;;  %4311 = vmatprep.subr.bf16.mxu1 %v4877_v23  ;;  %v2314_v51 = vld [vmem:[%s5800_s8 + $0x148] sm:$0xff] }
 0x452   : > { %4212 = vmatprep.subr.bf16.mxu0 %v4877_v23  ;;  %v4312_v52 = vpack.c.bf16 %v2314_v51, %v2313_v50  ;;  %v4366_v50 = vpack.c.bf16 %v2495_v46, %v2494_v45  ;;  %v2496_v51 = vld [vmem:[%s5800_s8 + $0x270] sm:$0xff] }
 0x454   : > { %4313 = vmatpush3.bf16.msra.mxu1 %v4312_v52  ;;  %v2497_v52 = vld [vmem:[%s5800_s8 + $0x278] sm:$0xff] }
 0x455   : > { %4214 = vmatpush1.bf16.msra.mxu0 %v4213_v54  ;;  %4314 = vmatprep.subr.bf16.mxu1 %v4877_v23  ;;  %v2316_v54 = vld [vmem:[%s5800_s8 + $0x158] sm:$0xff] }
 0x456   : > { %3613 = vmatprep.subr.mxu0 %v4876_v55 }
 0x458   : > { %1922 = vmatmul.mubr.f32.vlgmr.msra.gmra.mrb[14].mxu0 %v5360_v20 }
 0x459   : > { %3615 = vmatprep.mubr.msk.f32.mxu0 %vm4878_vm7, %v4876_v55 }
 0x4cb   : > { %v1655_v57 = vpop.f32.mrb[10].mxu0 }
 0x4cc   : > { %v1657_v58 = vpop.f32.mrb[11].mxu0 }
 0x4cd   : > { %v2317_v58 = vld [vmem:[%s5800_s8 + $0x160] sm:$0xff] }
 0x4cf   : > { %v1825_v59 = vpop.f32.mrb[14].mxu1 }
 0x4d0   : > { %v1827_v60 = vpop.f32.mrb[15].mxu1 }
 0x4fb   : > { %v1728_v61 = vpop.f32.mrb[12].mxu0 }
 0x4fc   : > { %v1729_v63 = vadd.f32 %v1728_v61, %v1655_v57  ;;  %v1730_v0 = vpop.f32.mrb[13].mxu0  ;;  %v4315_v57 = vpack.c.bf16 %v2316_v54, %v2315_v53  ;;  %v2319_v61 = vld [vmem:[%s5800_s8 + $0x170] sm:$0xff]  ;;  %v4297_v53 = vpack.c.bf16 %v2145_v49, %v2144_v48  ;;  %v2392_v54 = vld [vmem:[%s5800_s8 + $0x180] sm:$0xff] }
 0x4fe   : > { %v1829_v1 = vadd.f32 %v1825_v59, %v1729_v63  ;;  %4316 = vmatpush3.bf16.msra.mxu1 %v4315_v57  ;;  %v2318_v59 = vld [vmem:[%s5800_s8 + $0x168] sm:$0xff]  ;;  %v2320_v63 = vld [vmem:[%s5800_s8 + $0x178] sm:$0xff] }
 0x4ff   : > { %4317 = vmatprep.subr.bf16.mxu1 %v4877_v23  ;;  %v4318_v60 = vpack.c.bf16 %v2318_v59, %v2317_v58  ;;  %v4321_v0 = vpack.c.bf16 %v2320_v63, %v2319_v61  ;;  %v2393_v57 = vld [vmem:[%s5800_s8 + $0x188] sm:$0xff]  ;;  %v4369_v58 = vpack.c.bf16 %v2497_v52, %v2496_v51  ;;  %v2395_v61 = vld [vmem:[%s5800_s8 + $0x198] sm:$0xff] }
 0x500   : > { %v2021_v2 = vpop.f32.mrb[16].mxu1  ;;  %v4324_v59 = vpack.c.bf16 %v2393_v57, %v2392_v54  ;;  %v2681_v54 = vld [vmem:[#allocation13 + $0x68] sm:$0xff] }
 0x501   : > { %v2023_v3 = vpop.f32.mrb[17].mxu1 }
 0x502   : > { %4319 = vmatpush3.bf16.msra.mxu1 %v4318_v60  ;;  %v2482_v3 = vld [vmem:[%s5800_s8 + $0x200] sm:$0xff]  ;;  %v2394_v60 = vld [vmem:[%s5800_s8 + $0x190] sm:$0xff] }
 0x503   : > { %4320 = vmatprep.subr.bf16.mxu1 %v4877_v23  ;;  %v4327_v63 = vpack.c.bf16 %v2395_v61, %v2394_v60  ;;  %v2682_v61 = vld [vmem:[#allocation13 + $0x70] sm:$0xff] }
 0x506   : > { %4322 = vmatpush3.bf16.msra.mxu1 %v4321_v0  ;;  %v2396_v0 = vld [vmem:[%s5800_s8 + $0x1a0] sm:$0xff] }
 0x507   : > { %4347 = vmatprep.subr.bf16.mxu1 %v4877_v23 }
 0x52b   : > { %v1923_v56 = vpop.f32.mrb[14].mxu0 }
 0x52c   : > { %v1927_v20 = vadd.f32 %v1923_v56, %v1829_v1  ;;  %v1925_v4 = vpop.f32.mrb[15].mxu0  ;;  %v2130_v1 = vld [vmem:[%s5800_s8] sm:$0xff]  ;;  %v2483_v56 = vld [vmem:[%s5800_s8 + $0x208] sm:$0xff] }
 0x52e   : > { %v2025_v21 = vadd.f32 %v2021_v2, %v1927_v20  ;;  %v2131_v2 = vld [vmem:[%s5800_s8 + $0x8] sm:$0xff] }
 0x52f   : > { %v4276_v4 = vpack.c.bf16 %v2131_v2, %v2130_v1  ;;  %v2397_v1 = vld [vmem:[%s5800_s8 + $0x1a8] sm:$0xff] }
 0x530   : > { %v2033_v8 = vadd.f32 %v3399_v5, %v2025_v21  ;;  %v4330_v2 = vpack.c.bf16 %v2397_v1, %v2396_v0  ;;  %v2684_v1 = vld [vmem:[#allocation13 + $0x80] sm:$0xff] }
 0x532   : > { %v2034_v9 = vmax.f32 %v2033_v8, 0.0  ;;  %v4348_v8 = vpack.c.bf16 %v2483_v56, %v2482_v3  ;;  %v2398_v3 = vld [vmem:[%s5800_s8 + $0x1b0] sm:$0xff]  ;;  %v2399_v56 = vld [vmem:[%s5800_s8 + $0x1b8] sm:$0xff] }
 0x534   : > { %v2035_v16 = vpack.c.bf16 %v2034_v9, %v2034_v9  ;;  %3614 = vmatpush3.msra.mxu0 %v2034_v9  ;;  %v2484_v9 = vld [vmem:[%s5800_s8 + $0x210] sm:$0xff] }
 0x535   : > { %3616 = vmatmul.mubr.msk.f32.vlgmr.msra.gmra.mrb[16].mxu0 %vm2040_vm8, %v2037_v11  ;;  %4251 = vmatprep.subr.bf16.mxu0 %v4877_v23  ;;  %v2485_v11 = vld [vmem:[%s5800_s8 + $0x218] sm:$0xff] }
 0x536   : > { %2036 = vst [vmem:[%s668_s0] sm:$0xf] %v2035_v16  ;;  %3618 = vmatprep.mubr.msk.f32.mxu0 %vm4878_vm7, %v4876_v55  ;;  %4253 = vmatpush3.bf16.msra.mxu0 %v4252_v12  ;;  %v4279_v12 = vpack.c.bf16 %v2133_v7, %v2132_v6  ;;  %v2135_v16 = vld [vmem:[%s5800_s8 + $0x28] sm:$0xff]  ;;  %v2402_v6 = vld [vmem:[%s5800_s8 + $0x1d0] sm:$0xff]  ;;  %v2403_v7 = vld [vmem:[%s5800_s8 + $0x1d8] sm:$0xff] }
 0x537   : > { %4254 = vmatprep.subr.bf16.mxu0 %v4877_v23 }
 0x539   : > { %3619 = vmatmul.mubr.msk.f32.gmra.mrb[18].mxu0 %vm2040_vm8, %v2038_v18 }
 0x53a   : > { %3621 = vmatprep.mubr.msk.f32.mxu0 %vm4878_vm7, %v4876_v55  ;;  %4256 = vmatpush3.bf16.msra.mxu0 %v4255_v17  ;;  %v4351_v17 = vpack.c.bf16 %v2485_v11, %v2484_v9  ;;  %v2404_v9 = vld [vmem:[%s5800_s8 + $0x1e0] sm:$0xff]  ;;  %v2405_v11 = vld [vmem:[%s5800_s8 + $0x1e8] sm:$0xff] }
 0x53b   : > { %4257 = vmatprep.subr.bf16.mxu0 %v4877_v23 }
 0x53d   : > { %3622 = vmatmul.mubr.msk.f32.gmra.mrb[20].mxu0 %vm2040_vm8, %v2039_v24  ;;  %v4282_v24 = vpack.c.bf16 %v2135_v16, %v2134_v15  ;;  %v2406_v15 = vld [vmem:[%s5800_s8 + $0x1f0] sm:$0xff]  ;;  %v2407_v16 = vld [vmem:[%s5800_s8 + $0x1f8] sm:$0xff] }
 0x53e   : > { %4259 = vmatpush3.bf16.msra.mxu0 %v4258_v25  ;;  %3656 = vmatprep.mubr.msk.f32.mxu0 %vm4878_vm7, %v4876_v55 }
 0x53f   : > { %4260 = vmatprep.subr.bf16.mxu0 %v4877_v23 }
 0x542   : > { %4262 = vmatpush3.bf16.msra.mxu0 %v4261_v31 }
 0x543   : > { %4263 = vmatprep.subr.bf16.mxu0 %v4877_v23 }
 0x546   : > { %4265 = vmatpush3.bf16.msra.mxu0 %v4264_v13  ;;  %v2489_v13 = vld [vmem:[%s5800_s8 + $0x238] sm:$0xff] }
 0x547   : > { %4266 = vmatprep.subr.bf16.mxu0 %v4877_v23  ;;  %v4357_v35 = vpack.c.bf16 %v2489_v13, %v2488_v34  ;;  %v2673_v34 = vld [vmem:[#allocation13 + $0x28] sm:$0xff] }
 0x54a   : > { %4268 = vmatpush3.bf16.msra.mxu0 %v4267_v27  ;;  %v2139_v27 = vld [vmem:[%s5800_s8 + $0x48] sm:$0xff] }
 0x54b   : > { %4269 = vmatprep.subr.bf16.mxu0 %v4877_v23  ;;  %v4288_v37 = vpack.c.bf16 %v2139_v27, %v2138_v29  ;;  %v2676_v27 = vld [vmem:[#allocation13 + $0x40] sm:$0xff] }
 0x54e   : > { %4271 = vmatpush3.bf16.msra.mxu0 %v4270_v26  ;;  %v2491_v26 = vld [vmem:[%s5800_s8 + $0x248] sm:$0xff] }
 0x54f   : > { %4272 = vmatprep.subr.bf16.mxu0 %v4877_v23  ;;  %v4360_v39 = vpack.c.bf16 %v2491_v26, %v2490_v36  ;;  %v2678_v26 = vld [vmem:[#allocation13 + $0x50] sm:$0xff] }
 0x552   : > { %4274 = vmatpush3.bf16.msra.mxu0 %v4273_v32  ;;  %v2141_v32 = vld [vmem:[%s5800_s8 + $0x58] sm:$0xff] }
 0x553   : > { %4275 = vmatprep.subr.bf16.mxu0 %v4877_v23  ;;  %v4291_v42 = vpack.c.bf16 %v2141_v32, %v2140_v38 }
 0x608   : > { %v5552_v20 = vpop.f32.mrb[16].mxu0 }
 0x609   : > { %v2163_v5 = vrot.slane %v5552_v20, 4  ;;  %v3617_v21 = vpop.f32.mrb[17].mxu0 }
 0x60b   : > { %3657 = vmatmul.mubr.f32.vlgmr.msra.gmra.mrb[22].mxu0 %v2163_v5  ;;  %v2401_v5 = vld [vmem:[%s5800_s8 + $0x1c8] sm:$0xff] }
 0x60c   : > { %4277 = vmatpush3.bf16.msra.mxu0 %v4276_v4  ;;  %3691 = vmatprep.mubr.msk.f32.mxu0 %vm4878_vm7, %v4876_v55  ;;  %v5569_v14 = vpop.f32.mrb[18].mxu0  ;;  %v2400_v4 = vld [vmem:[%s5800_s8 + $0x1c0] sm:$0xff] }
 0x60d   : > { %4278 = vmatprep.subr.bf16.mxu0 %v4877_v23  ;;  %v3620_v18 = vpop.f32.mrb[19].mxu0  ;;  %3727 = vmatmul.mubr.f32.vlgmr.msra.gmra.mrb[18].mxu1 %v5569_v14  ;;  %v4336_v21 = vpack.c.bf16 %v2401_v5, %v2400_v4  ;;  %v2688_v5 = vld [vmem:[#allocation13 + $0xa0] sm:$0xff] }
 0x60e   : > { %4349 = vmatpush3.bf16.msra.mxu1 %v4348_v8  ;;  %3796 = vmatprep.mubr.msk.f32.mxu1 %vm4878_vm7, %v4876_v55  ;;  %v4339_v8 = vpack.c.bf16 %v2403_v7, %v2402_v6  ;;  %v4345_v18 = vpack.c.bf16 %v2407_v16, %v2406_v15  ;;  %v2690_v7 = vld [vmem:[#allocation13 + $0xb0] sm:$0xff]  ;;  %v2838_v15 = vld [vmem:[#allocation13 + $0xc0] sm:$0xff]  ;;  %v2839_v16 = vld [vmem:[#allocation13 + $0xc8] sm:$0xff] }
 0x60f   : > { %4350 = vmatprep.subr.bf16.mxu1 %v4877_v23 }
 0x610   : > { %4280 = vmatpush3.bf16.msra.mxu0 %v4279_v12  ;;  %v5588_v25 = vpop.f32.mrb[20].mxu0  ;;  %v4342_v12 = vpack.c.bf16 %v2405_v11, %v2404_v9  ;;  %v2924_v11 = vld [vmem:[#allocation13 + $0x120] sm:$0xff] }
 0x611   : > { %4281 = vmatprep.subr.bf16.mxu0 %v4877_v23  ;;  %v3623_v31 = vpop.f32.mrb[21].mxu0 }
 0x612   : > { %4352 = vmatpush3.bf16.msra.mxu1 %v4351_v17  ;;  %v2409_v17 = vrot.slane %v5569_v14, 4  ;;  %v4393_v31 = vpack.c.bf16 %v2671_v30, %v2670_v28  ;;  %v2674_v14 = vld [vmem:[#allocation13 + $0x30] sm:$0xff] }
 0x613   : > { %4353 = vmatprep.subr.bf16.mxu1 %v4877_v23  ;;  %v2840_v30 = vld [vmem:[#allocation13 + $0xd0] sm:$0xff] }
 0x614   : > { %4283 = vmatpush3.bf16.msra.mxu0 %v4282_v24  ;;  %v2669_v24 = vld [vmem:[#allocation13 + $0x8] sm:$0xff] }
 0x615   : > { %4284 = vmatprep.subr.bf16.mxu0 %v4877_v23 }
 0x616   : > { %4355 = vmatpush3.bf16.msra.mxu1 %v4354_v33  ;;  %v2672_v33 = vld [vmem:[#allocation13 + $0x20] sm:$0xff] }
 0x617   : > { %4356 = vmatprep.subr.bf16.mxu1 %v4877_v23  ;;  %v4396_v13 = vpack.c.bf16 %v2673_v34, %v2672_v33  ;;  %v2928_v34 = vld [vmem:[#allocation13 + $0x140] sm:$0xff] }
 0x618   : > { %4286 = vmatpush3.bf16.msra.mxu0 %v4285_v62  ;;  %v2675_v62 = vld [vmem:[#allocation13 + $0x38] sm:$0xff] }
 0x619   : > { %4287 = vmatprep.subr.bf16.mxu0 %v4877_v23  ;;  %v4399_v29 = vpack.c.bf16 %v2675_v62, %v2674_v14  ;;  %v2842_v62 = vld [vmem:[#allocation13 + $0xe0] sm:$0xff] }
 0x61a   : > { %4358 = vmatpush3.bf16.msra.mxu1 %v4357_v35  ;;  %v2677_v35 = vld [vmem:[#allocation13 + $0x48] sm:$0xff] }
 0x61b   : > { %4359 = vmatprep.subr.bf16.mxu1 %v4877_v23  ;;  %v4402_v36 = vpack.c.bf16 %v2677_v35, %v2676_v27  ;;  %v2930_v35 = vld [vmem:[#allocation13 + $0x150] sm:$0xff] }
 0x61c   : > { %4289 = vmatpush3.bf16.msra.mxu0 %v4288_v37  ;;  %v2679_v37 = vld [vmem:[#allocation13 + $0x58] sm:$0xff] }
 0x61d   : > { %4290 = vmatprep.subr.bf16.mxu0 %v4877_v23  ;;  %v4405_v38 = vpack.c.bf16 %v2679_v37, %v2678_v26  ;;  %v2844_v37 = vld [vmem:[#allocation13 + $0xf0] sm:$0xff] }
 0x61e   : > { %4361 = vmatpush3.bf16.msra.mxu1 %v4360_v39 }
 0x61f   : > { %4362 = vmatprep.subr.bf16.mxu1 %v4877_v23 }
 0x620   : > { %4292 = vmatpush3.bf16.msra.mxu0 %v4291_v42 }
 0x621   : > { %4293 = vmatprep.subr.bf16.mxu0 %v4877_v23 }
 0x622   : > { %4364 = vmatpush3.bf16.msra.mxu1 %v4363_v44 }
 0x623   : > { %4365 = vmatprep.subr.bf16.mxu1 %v4877_v23 }
 0x624   : > { %4295 = vmatpush3.bf16.msra.mxu0 %v4294_v47 }
 0x625   : > { %4296 = vmatprep.subr.bf16.mxu0 %v4877_v23 }
 0x626   : > { %4367 = vmatpush3.bf16.msra.mxu1 %v4366_v50  ;;  %v3403_v50 = vld [vmem:[#allocation10] ss:$0 sm:$0xff] }
 0x627   : > { %4368 = vmatprep.subr.bf16.mxu1 %v4877_v23 }
 0x628   : > { %4298 = vmatpush3.bf16.msra.mxu0 %v4297_v53  ;;  %v2680_v53 = vld [vmem:[#allocation13 + $0x60] sm:$0xff] }
 0x629   : > { %4323 = vmatprep.subr.bf16.mxu0 %v4877_v23 }
 0x62a   : > { %4370 = vmatpush3.bf16.msra.mxu1 %v4369_v58  ;;  %v2582_v58 = vld [vmem:[#allocation12 + $0x8] sm:$0x3] }
 0x62b   : > { %3692 = vmatmul.mubr.f32.vlgmr.msra.gmra.mrb[24].mxu0 %v5552_v20  ;;  %4389 = vmatprep.subr.bf16.mxu1 %v4877_v23  ;;  %v4333_v20 = vpack.c.bf16 %v2399_v56, %v2398_v3  ;;  %v2686_v56 = vld [vmem:[#allocation13 + $0x90] sm:$0xff] }
 0x62c   : > { %4325 = vmatpush3.bf16.msra.mxu0 %v4324_v59  ;;  %3761 = vmatprep.mubr.msk.f32.mxu0 %vm4878_vm7, %v4876_v55  ;;  %v4372_v59 = vpack.c.bf16 %v2681_v54, %v2680_v53 }
 0x62d   : > { %4326 = vmatprep.subr.bf16.mxu0 %v4877_v23  ;;  %3797 = vmatmul.mubr.f32.vlgmr.msra.gmra.mrb[20].mxu1 %v5588_v25  ;;  %v4390_v25 = vpack.c.bf16 %v2669_v24, %v2668_v22  ;;  %v2927_v22 = vld [vmem:[#allocation13 + $0x138] sm:$0xff] }
 0x62e   : > { %3855 = vmatprep.mubr.msk.f32.mxu1 %vm4878_vm7, %v4876_v55 }
 0x62f   : > { %4391 = vmatpush3.bf16.msra.mxu1 %v4390_v25  ;;  %v4408_v25 = vpack.c.bf16 %v2839_v16, %v2838_v15 }
 0x630   : > { %4328 = vmatpush3.bf16.msra.mxu0 %v4327_v63  ;;  %4392 = vmatprep.subr.bf16.mxu1 %v4877_v23  ;;  %v2683_v63 = vld [vmem:[#allocation13 + $0x78] sm:$0xff] }
 0x631   : > { %4329 = vmatprep.subr.bf16.mxu0 %v4877_v23  ;;  %v4375_v0 = vpack.c.bf16 %v2683_v63, %v2682_v61  ;;  %v3014_v61 = vld [vmem:[#allocation13 + $0x1a0] sm:$0xff]  ;;  %v3015_v63 = vld [vmem:[#allocation13 + $0x1a8] sm:$0xff] }
 0x633   : > { %4394 = vmatpush3.bf16.msra.mxu1 %v4393_v31  ;;  %v2841_v31 = vld [vmem:[#allocation13 + $0xd8] sm:$0xff] }
 0x634   : > { %4331 = vmatpush3.bf16.msra.mxu0 %v4330_v2  ;;  %4395 = vmatprep.subr.bf16.mxu1 %v4877_v23  ;;  %v2685_v2 = vld [vmem:[#allocation13 + $0x88] sm:$0xff]  ;;  %v4411_v14 = vpack.c.bf16 %v2841_v31, %v2840_v30 }
 0x635   : > { %4332 = vmatprep.subr.bf16.mxu0 %v4877_v23  ;;  %v4378_v3 = vpack.c.bf16 %v2685_v2, %v2684_v1  ;;  %v3016_v1 = vld [vmem:[#allocation13 + $0x1b0] sm:$0xff]  ;;  %v3017_v2 = vld [vmem:[#allocation13 + $0x1b8] sm:$0xff] }
 0x637   : > { %4397 = vmatpush3.bf16.msra.mxu1 %v4396_v13  ;;  %v2929_v13 = vld [vmem:[#allocation13 + $0x148] sm:$0xff] }
 0x638   : > { %4334 = vmatpush3.bf16.msra.mxu0 %v4333_v20  ;;  %4398 = vmatprep.subr.bf16.mxu1 %v4877_v23  ;;  %v2687_v20 = vld [vmem:[#allocation13 + $0x98] sm:$0xff]  ;;  %v4432_v27 = vpack.c.bf16 %v2929_v13, %v2928_v34 }
 0x639   : > { %4335 = vmatprep.subr.bf16.mxu0 %v4877_v23  ;;  %v4381_v4 = vpack.c.bf16 %v2687_v20, %v2686_v56  ;;  %v3018_v56 = vld [vmem:[#allocation13 + $0x1c0] sm:$0xff]  ;;  %v3019_v20 = vld [vmem:[#allocation13 + $0x1c8] sm:$0xff] }
 0x63b   : > { %4400 = vmatpush3.bf16.msra.mxu1 %v4399_v29  ;;  %v2843_v29 = vld [vmem:[#allocation13 + $0xe8] sm:$0xff] }
 0x63c   : > { %4337 = vmatpush3.bf16.msra.mxu0 %v4336_v21  ;;  %4401 = vmatprep.subr.bf16.mxu1 %v4877_v23  ;;  %v2689_v21 = vld [vmem:[#allocation13 + $0xa8] sm:$0xff]  ;;  %v4414_v26 = vpack.c.bf16 %v2843_v29, %v2842_v62 }
 0x63d   : > { %4338 = vmatprep.subr.bf16.mxu0 %v4877_v23  ;;  %v4384_v6 = vpack.c.bf16 %v2689_v21, %v2688_v5  ;;  %v3021_v5 = vld [vmem:[#allocation13 + $0x1d8] sm:$0xff] }
 0x63f   : > { %4403 = vmatpush3.bf16.msra.mxu1 %v4402_v36  ;;  %v2931_v36 = vld [vmem:[#allocation13 + $0x158] sm:$0xff] }
 0x640   : > { %4340 = vmatpush3.bf16.msra.mxu0 %v4339_v8  ;;  %4404 = vmatprep.subr.bf16.mxu1 %v4877_v23  ;;  %v2691_v8 = vld [vmem:[#allocation13 + $0xb8] sm:$0xff] }
 0x641   : > { %4341 = vmatprep.subr.bf16.mxu0 %v4877_v23  ;;  %v4387_v9 = vpack.c.bf16 %v2691_v8, %v2690_v7 }
 0x643   : > { %4406 = vmatpush3.bf16.msra.mxu1 %v4405_v38  ;;  %v2845_v38 = vld [vmem:[#allocation13 + $0xf8] sm:$0xff] }
 0x644   : > { %4343 = vmatpush3.bf16.msra.mxu0 %v4342_v12  ;;  %4425 = vmatprep.subr.bf16.mxu1 %v4877_v23  ;;  %v2925_v12 = vld [vmem:[#allocation13 + $0x128] sm:$0xff] }
 0x645   : > { %4344 = vmatprep.subr.bf16.mxu0 %v4877_v23 }
 0x648   : > { %4346 = vmatpush3.bf16.msra.mxu0 %v4345_v18  ;;  %v4426_v18 = vpack.c.bf16 %v2925_v12, %v2924_v11 }
 0x64b   : > { %3762 = vmatmul.mubr.f32.vlgmr.msra.gmra.mrb[26].mxu0 %v2409_v17 }
 0x64c   : > { %3801 = vmatprep.mubr.msk.f32.mxu0 %vm2583_vm9, %v2581_v19  ;;  %v2926_v19 = vld [vmem:[#allocation13 + $0x130] sm:$0xff] }
 0x64d   : > { %v4429_v33 = vpack.c.bf16 %v2927_v22, %v2926_v19 }
 0x6de   : > { %v2231_v32 = vpop.f32.mrb[22].mxu0 }
 0x6df   : > { %v3658_v39 = vpop.f32.mrb[23].mxu0 }
 0x6e0   : > { %v2387_v40 = vpop.f32.mrb[18].mxu1  ;;  %v2932_v39 = vld [vmem:[#allocation13 + $0x160] sm:$0xff] }
 0x6e1   : > { %v3728_v41 = vpop.f32.mrb[19].mxu1 }
 0x6e2   : > { %v4417_v41 = vpack.c.bf16 %v2845_v38, %v2844_v37 }
 0x6fe   : > { %v2301_v42 = vpop.f32.mrb[24].mxu0 }
 0x6ff   : > { %v2302_v43 = vadd.f32 %v2301_v42, %v2231_v32  ;;  %v3693_v10 = vpop.f32.mrb[25].mxu0  ;;  %v4435_v32 = vpack.c.bf16 %v2931_v36, %v2930_v35  ;;  %v2846_v42 = vld [vmem:[#allocation13 + $0x100] sm:$0xff] }
 0x700   : > { %v2564_v44 = vpop.f32.mrb[20].mxu1 }
 0x701   : > { %v2391_v45 = vadd.f32 %v2387_v40, %v2302_v43  ;;  %v3798_v46 = vpop.f32.mrb[21].mxu1  ;;  %v2933_v40 = vld [vmem:[#allocation13 + $0x168] sm:$0xff] }
 0x702   : > { %v2847_v43 = vld [vmem:[#allocation13 + $0x108] sm:$0xff]  ;;  %v4438_v10 = vpack.c.bf16 %v2933_v40, %v2932_v39 }
 0x703   : > { %v4420_v46 = vpack.c.bf16 %v2847_v43, %v2846_v42 }
 0x71e   : > { %v2477_v47 = vpop.f32.mrb[26].mxu0 }
 0x71f   : > { %v2481_v48 = vadd.f32 %v2477_v47, %v2391_v45  ;;  %v3763_v49 = vpop.f32.mrb[27].mxu0  ;;  %v2935_v45 = vld [vmem:[#allocation13 + $0x178] sm:$0xff]  ;;  %v2848_v47 = vld [vmem:[#allocation13 + $0x110] sm:$0xff] }
 0x721   : > { %v2568_v51 = vadd.f32 %v2564_v44, %v2481_v48  ;;  %v2934_v44 = vld [vmem:[#allocation13 + $0x170] sm:$0xff]  ;;  %v2849_v48 = vld [vmem:[#allocation13 + $0x118] sm:$0xff] }
 0x722   : > { %v4441_v49 = vpack.c.bf16 %v2935_v45, %v2934_v44 }
 0x723   : > { %v2576_v52 = vadd.f32 %v3403_v50, %v2568_v51  ;;  %v4423_v50 = vpack.c.bf16 %v2849_v48, %v2848_v47  ;;  %v3010_v51 = vld [vmem:[#allocation13 + $0x180] sm:$0xff] }
 0x725   : > { %v2577_v57 = vmax.f32 %v2576_v52, 0.0  ;;  %v3011_v52 = vld [vmem:[#allocation13 + $0x188] sm:$0xff] }
 0x726   : > { %v4444_v54 = vpack.c.bf16 %v3011_v52, %v3010_v51 }
 0x727   : > { %v2578_v60 = vpack.c.bf16 %v2577_v57, %v2577_v57  ;;  %3799 = vmatprep.subr.msk.mxu0 %vm1416_vm2, %v2577_v57 }
 0x728   : > { %3800 = vmatpush3.msk.msra.mxu0 %vm1416_vm2, %v2577_v57 }
 0x729   : > { %2580 = vst.msk [vmem:[%s672_s16] sm:$0x3] %vm2579_vm10, %v2578_v60  ;;  %3802 = vmatmul.mubr.msk.f32.vlgmr.msra.gmra.mrb[28].mxu0 %vm2583_vm9, %v2582_v58  ;;  %4371 = vmatprep.subr.bf16.mxu0 %v4877_v23  ;;  %v3012_v58 = vld [vmem:[#allocation13 + $0x190] sm:$0xff] }
 0x72a   : > { %4373 = vmatpush3.bf16.msra.mxu0 %v4372_v59  ;;  %3828 = vmatprep.mubr.msk.f32.mxu0 %vm4878_vm7, %v4876_v55  ;;  %v3013_v59 = vld [vmem:[#allocation13 + $0x198] sm:$0xff] }
 0x72b   : > { %4374 = vmatprep.subr.bf16.mxu0 %v4877_v23  ;;  %v4447_v60 = vpack.c.bf16 %v3013_v59, %v3012_v58 }
 0x72e   : > { %4376 = vmatpush3.bf16.msra.mxu0 %v4375_v0  ;;  %v4450_v0 = vpack.c.bf16 %v3015_v63, %v3014_v61 }
 0x72f   : > { %4377 = vmatprep.subr.bf16.mxu0 %v4877_v23 }
 0x732   : > { %4379 = vmatpush3.bf16.msra.mxu0 %v4378_v3  ;;  %v4453_v3 = vpack.c.bf16 %v3017_v2, %v3016_v1 }
 0x733   : > { %4380 = vmatprep.subr.bf16.mxu0 %v4877_v23 }
 0x736   : > { %4382 = vmatpush3.bf16.msra.mxu0 %v4381_v4  ;;  %v4456_v4 = vpack.c.bf16 %v3019_v20, %v3018_v56 }
 0x737   : > { %4383 = vmatprep.subr.bf16.mxu0 %v4877_v23 }
 0x73a   : > { %4385 = vmatpush3.bf16.msra.mxu0 %v4384_v6 }
 0x73b   : > { %4386 = vmatprep.subr.bf16.mxu0 %v4877_v23 }
 0x73e   : > { %4388 = vmatpush3.bf16.msra.mxu0 %v4387_v9 }
 0x73f   : > { %4407 = vmatprep.subr.bf16.mxu0 %v4877_v23 }
 0x7fc   : > { %v5749_v17 = vpop.f32.mrb[28].mxu0 }
 0x7fd   : > { %v5751_v24 = vpop.f32.mrb[29].mxu0 }
 0x7fe   : > { %v2693_v28 = vrot.slane %v5751_v24, 2  ;;  %3856 = vmatmul.mubr.msk.f32.vlgmr.msra.gmra.mrb[22].mxu1 %vm884_vm1, %v5751_v24  ;;  %v2936_v53 = vrot.slane %v5751_v24, 6  ;;  %v2850_v57 = vrot.slane %v5751_v24, 4 }
 0x7ff   : > { %4427 = vmatpush3.bf16.msra.mxu1 %v4426_v18  ;;  %3909 = vmatprep.mubr.msk.f32.mxu1 %vm4878_vm7, %v4876_v55 }
 0x800   : > { %3829 = vmatmul.mubr.msk.f32.vlgmr.msra.gmra.mrb[30].mxu0 %vm884_vm1, %v2693_v28  ;;  %4428 = vmatprep.subr.bf16.mxu1 %v4877_v23 }
 0x801   : > { %4409 = vmatpush3.bf16.msra.mxu0 %v4408_v25  ;;  %3882 = vmatprep.mubr.msk.f32.mxu0 %vm4878_vm7, %v4876_v55  ;;  %v3412_v25 = vld [vmem:[#allocation15] ss:$0 sm:$0xff] }
 0x802   : > { %4410 = vmatprep.subr.bf16.mxu0 %v4877_v23 }
 0x803   : > { %4430 = vmatpush3.bf16.msra.mxu1 %v4429_v33 }
 0x804   : > { %4431 = vmatprep.subr.bf16.mxu1 %v4877_v23 }
 0x805   : > { %4412 = vmatpush3.bf16.msra.mxu0 %v4411_v14 }
 0x806   : > { %4413 = vmatprep.subr.bf16.mxu0 %v4877_v23 }
 0x807   : > { %4433 = vmatpush3.bf16.msra.mxu1 %v4432_v27 }
 0x808   : > { %4434 = vmatprep.subr.bf16.mxu1 %v4877_v23 }
 0x809   : > { %4415 = vmatpush3.bf16.msra.mxu0 %v4414_v26 }
 0x80a   : > { %4416 = vmatprep.subr.bf16.mxu0 %v4877_v23 }
 0x80b   : > { %4436 = vmatpush3.bf16.msra.mxu1 %v4435_v32 }
 0x80c   : > { %4437 = vmatprep.subr.bf16.mxu1 %v4877_v23 }
 0x80d   : > { %4418 = vmatpush3.bf16.msra.mxu0 %v4417_v41 }
 0x80e   : > { %4419 = vmatprep.subr.bf16.mxu0 %v4877_v23 }
 0x80f   : > { %4439 = vmatpush3.bf16.msra.mxu1 %v4438_v10 }
 0x810   : > { %4440 = vmatprep.subr.bf16.mxu1 %v4877_v23 }
 0x811   : > { %4421 = vmatpush3.bf16.msra.mxu0 %v4420_v46 }
 0x812   : > { %4422 = vmatprep.subr.bf16.mxu0 %v4877_v23 }
 0x813   : > { %4442 = vmatpush3.bf16.msra.mxu1 %v4441_v49 }
 0x815   : > { %4424 = vmatpush3.bf16.msra.mxu0 %v4423_v50 }
 0x816   : > { %3910 = vmatmul.mubr.msk.f32.vlgmr.msra.gmra.mrb[24].mxu1 %vm884_vm1, %v2936_v53  ;;  %4443 = vmatprep.subr.bf16.mxu0 %v4877_v23 }
 0x818   : > { %3883 = vmatmul.mubr.msk.f32.vlgmr.msra.gmra.mrb[32].mxu0 %vm884_vm1, %v2850_v57 }
 0x819   : > { %4445 = vmatpush3.bf16.msra.mxu0 %v4444_v54  ;;  %3936 = vmatprep.mubr.msk.f32.mxu0 %vm4878_vm7, %v4876_v55  ;;  %v3020_v55 = vld [vmem:[#allocation13 + $0x1d0] sm:$0xff] }
 0x81a   : > { %4446 = vmatprep.subr.bf16.mxu0 %v4877_v23  ;;  %v4459_v21 = vpack.c.bf16 %v3021_v5, %v3020_v55 }
 0x81d   : > { %4448 = vmatpush3.bf16.msra.mxu0 %v4447_v60 }
 0x81e   : > { %4449 = vmatprep.subr.bf16.mxu0 %v4877_v23 }
 0x821   : > { %4451 = vmatpush3.bf16.msra.mxu0 %v4450_v0 }
 0x822   : > { %4452 = vmatprep.subr.bf16.mxu0 %v4877_v23 }
 0x825   : > { %4454 = vmatpush3.bf16.msra.mxu0 %v4453_v3 }
 0x826   : > { %4455 = vmatprep.subr.bf16.mxu0 %v4877_v23 }
 0x829   : > { %4457 = vmatpush3.bf16.msra.mxu0 %v4456_v4 }
 0x82a   : > { %4458 = vmatprep.subr.bf16.mxu0 %v4877_v23 }
 0x82d   : > { %4460 = vmatpush3.bf16.msra.mxu0 %v4459_v21 }
 0x830   : > { %3937 = vmatmul.mubr.msk.f32.vlgmr.msra.gmra.mrb[34].mxu0 %vm884_vm1, %v5749_v17 }
 0x8d1   : > { %v2834_v6 = vpop.f32.mrb[22].mxu1 }
 0x8d2   : > { %v3857_v7 = vpop.f32.mrb[23].mxu1 }
 0x8d3   : > { %v2762_v8 = vpop.f32.mrb[30].mxu0 }
 0x8d4   : > { %v2835_v9 = vadd.f32 %v2834_v6, %v2762_v8  ;;  %v3830_v11 = vpop.f32.mrb[31].mxu0 }
 0x8e9   : > { %v3005_v12 = vpop.f32.mrb[24].mxu1 }
 0x8ea   : > { %v3911_v15 = vpop.f32.mrb[25].mxu1 }
 0x8eb   : > { %v2919_v16 = vpop.f32.mrb[32].mxu0 }
 0x8ec   : > { %v2923_v18 = vadd.f32 %v2919_v16, %v2835_v9  ;;  %v3884_v19 = vpop.f32.mrb[33].mxu0 }
 0x8ee   : > { %v3009_v22 = vadd.f32 %v3005_v12, %v2923_v18 }
 0x903   : > { %v3091_v24 = vpop.f32.mrb[34].mxu0 }
 0x904   : > { %v3095_v28 = vadd.f32 %v3091_v24, %v3009_v22  ;;  %v3938_v23 = vpop.f32.mrb[35].mxu0 }
 0x906   : > { %v3103_v30 = vadd.f32 %v3412_v25, %v3095_v28 }
 0x908   : > { %v3104_v31 = vmax.f32 %v3103_v30, 0.0 }
 0x90a   : > { %v3105_v17 = vpack.c.bf16 %v3104_v31, %v3104_v31 }
 0x90c   : > { %3107 = vst.msk [vmem:[%s675_s18] sm:$0x1] %vm3106_vm11, %v3105_v17 }
 0x90d PF: > { %s5835_s21 = sld [smem:[#allocation21_spill]] }
 0x913   : > { %s32_s21 = sadd.s32 1, %s5835_s21  }
 0x914   : > { %p29_p11 = scmp.ge.s32.totalorder %s32_s21, 4  }
 0x916   :  { %31 = sbr.rel (!%p29_p11) target bundleno = 10 (0xa), region = 175 }
 0x91d   :  { %3169 = vsyncpa [#allocation3], 1 }
 0x91e   :  { %3171 = vsyncpa [#allocation3 + $0x1], 1 }
 0x91f   :  { %3172 = vsyncpa [#allocation5], 1 }
 0x920   :  { %3173 = vsyncpa [#allocation8], 1 }
 0x921   :  { %3174 = vsyncpa [#allocation11], 1 }
 0x922   :  { %3175 = vsyncpa [#allocation14], 1 }

</bundles_post_ra>
